<compile_context>
chip_gen: v7x
topology: tpu7x:2x2x1
jax: 0.10.0
libtpu: 0.0.40
codegen_flags: <defaults>
</compile_context>

<pallas_src>
import functools

import jax
import jax.numpy as jnp
from jax.experimental import pallas as pl
from jax.experimental.pallas import tpu as pltpu


def _round_up(n, m):
    return ((n + m - 1) // m) * m


def _mish(x):
    # mish(x) = x * tanh(softplus(x)).
    # With e = exp(x):  tanh(softplus(x)) = (e^2 + 2e) / (e^2 + 2e + 2).
    # Rewritten with u = exp(-|x|) for numerical stability -> one exp per element,
    # one approx reciprocal (EUP), rest is cheap VPU arithmetic.
    u = jnp.exp(-jnp.abs(x))
    pos_num = 1.0 + 2.0 * u                 # x >= 0 branch (scaled by exp(-2x))
    pos_den = pos_num + 2.0 * u * u
    neg_num = u * (u + 2.0)                 # x <  0 branch
    neg_den = neg_num + 2.0
    num = jnp.where(x >= 0.0, pos_num, neg_num)
    den = jnp.where(x >= 0.0, pos_den, neg_den)
    return x * num * pl.reciprocal(den, approx=True)


def branch_cnn_kernel(
    x_ref,
    w1_ref, b1_ref,
    w2_ref, b2_ref,
    w3_ref, b3_ref,
    w4_ref, b4_ref,
    out_ref,
):
    # Elementwise math stays in f32; only the MXU operands are bf16.
    h = x_ref[...].astype(jnp.float32)

    # block 1: (folded Linear+BN)(D_in, 1024) + Mish
    h = jnp.dot(h.astype(jnp.bfloat16), w1_ref[...],
                preferred_element_type=jnp.float32) + b1_ref[...]
    h = _mish(h)

    # block 2: (folded Linear+BN)(1024, 512) + Mish
    h = jnp.dot(h.astype(jnp.bfloat16), w2_ref[...],
                preferred_element_type=jnp.float32) + b2_ref[...]
    h = _mish(h)

    # block 3: (folded Linear+BN)(512, 256) + Mish
    h = jnp.dot(h.astype(jnp.bfloat16), w3_ref[...],
                preferred_element_type=jnp.float32) + b3_ref[...]
    h = _mish(h)

    # output head: Linear(256, num_classes_padded)
    out_ref[...] = jnp.dot(h.astype(jnp.bfloat16), w4_ref[...],
                           preferred_element_type=jnp.float32) + b4_ref[...]


def init_params(key, num_in_features, num_classes, dtype=jnp.float32):
    """Deterministic synthetic parameter init (matches shapes of the PyTorch module)."""
    dims = [num_in_features + 2, 1024, 512, 256, num_classes]
    ks = jax.random.split(key, 20)
    params = {}
    ki = 0
    for li in range(4):
        fan_in, fan_out = dims[li], dims[li + 1]
        bound = 1.0 / jnp.sqrt(fan_in)
        params[f"w{li + 1}"] = jax.random.uniform(
            ks[ki], (fan_in, fan_out), dtype, -bound, bound)
        ki += 1
        params[f"b{li + 1}"] = jax.random.uniform(
            ks[ki], (fan_out,), dtype, -bound, bound)
        ki += 1
    # BatchNorm params for the 3 hidden blocks (independent keys).
    for li, width in enumerate([1024, 512, 256], start=1):
        params[f"gamma{li}"] = 1.0 + 0.1 * jax.random.normal(ks[ki], (width,), dtype)
        params[f"beta{li}"] = 0.1 * jax.random.normal(ks[ki + 1], (width,), dtype)
        params[f"rmean{li}"] = 0.05 * jax.random.normal(ks[ki + 2], (width,), dtype)
        params[f"rvar{li}"] = 1.0 + 0.1 * jnp.abs(
            jax.random.normal(ks[ki + 3], (width,), dtype))
        ki += 4
    return params


@functools.partial(jax.jit, static_argnames=("num_classes", "b_tile"))
def branch_cnn_forward(x, additional_features, params, *, num_classes, b_tile=None):
    """x: [B, num_in_features], additional_features: [B, 2] -> [B, num_classes]."""
    eps = 1e-5
    combined = jnp.concatenate([x, additional_features], axis=1).astype(jnp.float32)
    B, D_in = combined.shape

    # Lane-friendly padding (zeros are no-ops for the matmuls).
    D_in_p = _round_up(D_in, 128)
    C_p = _round_up(num_classes, 128)
    if b_tile is None:
        # 256-row tiles keep the v6e/v7x MXU full; small batches fall back to
        # a single sublane-aligned tile.
        b_tile = min(256, _round_up(B, 8))
    B_p = _round_up(B, b_tile)

    x_p = jnp.pad(combined, ((0, B_p - B), (0, D_in_p - D_in)))

    def fold_bn(i, w, b):
        # Fold BatchNorm (running stats) into the preceding Linear, in f32.
        s = params[f"gamma{i}"] / jnp.sqrt(params[f"rvar{i}"] + eps)
        t = params[f"beta{i}"] - params[f"rmean{i}"] * s
        return w * s[None, :], b * s + t

    w1, b1 = fold_bn(1, params["w1"], params["b1"])
    w2, b2 = fold_bn(2, params["w2"], params["b2"])
    w3, b3 = fold_bn(3, params["w3"], params["b3"])
    w4, b4 = params["w4"], params["b4"]

    w1 = jnp.pad(w1, ((0, D_in_p - D_in), (0, 0)))
    w4 = jnp.pad(w4, ((0, 0), (0, C_p - num_classes)))
    b4 = jnp.pad(b4, (0, C_p - num_classes))

    # bf16 weights (MXU-native, halves weight DMA); biases stay f32.
    w1, w2, w3, w4 = (w.astype(jnp.bfloat16) for w in (w1, w2, w3, w4))
    b1, b2, b3, b4 = (b.reshape(1, -1).astype(jnp.float32) for b in (b1, b2, b3, b4))

    H1, H2, H3 = 1024, 512, 256
    grid = (B_p // b_tile,)
    const = lambda i: (0, 0)   # weights/biases stay VMEM-resident across steps

    out_p = pl.pallas_call(
        branch_cnn_kernel,
        out_shape=jax.ShapeDtypeStruct((B_p, C_p), jnp.float32),
        grid=grid,
        in_specs=[
            pl.BlockSpec((b_tile, D_in_p), lambda i: (i, 0)),
            pl.BlockSpec((D_in_p, H1), const),
            pl.BlockSpec((1, H1), const),
            pl.BlockSpec((H1, H2), const),
            pl.BlockSpec((1, H2), const),
            pl.BlockSpec((H2, H3), const),
            pl.BlockSpec((1, H3), const),
            pl.BlockSpec((H3, C_p), const),
            pl.BlockSpec((1, C_p), const),
        ],
        out_specs=pl.BlockSpec((b_tile, C_p), lambda i: (i, 0)),
        compiler_params=pltpu.CompilerParams(
            dimension_semantics=("parallel",),
            vmem_limit_bytes=32 << 20,
        ),
    )(x_p, w1, b1, w2, b2, w3, b3, w4, b4)

    return out_p[:B, :num_classes]


def _reference_forward(x, additional_features, params, num_classes):
    """Plain-JAX f32 reference (eval-mode PyTorch semantics)."""
    eps = 1e-5
    h = jnp.concatenate([x, additional_features], axis=1).astype(jnp.float32)
    for i in range(1, 4):
        h = h @ params[f"w{i}"] + params[f"b{i}"]
        h = (h - params[f"rmean{i}"]) / jnp.sqrt(params[f"rvar{i}"] + eps)
        h = h * params[f"gamma{i}"] + params[f"beta{i}"]
        h = h * jnp.tanh(jnp.logaddexp(h, 0.0))  # Mish
        # TODO(synk): Dropout is identity in eval mode; training-mode dropout not implemented.
    return h @ params["w4"] + params["b4"]


if __name__ == "__main__":
    num_in_features = 32
    num_classes = 10
    batch = 32

    key = jax.random.PRNGKey(0)
    k_params, k_x, k_add = jax.random.split(key, 3)

    params = init_params(k_params, num_in_features, num_classes)
    x = jax.random.normal(k_x, (batch, num_in_features), jnp.float32)
    additional_features = jax.random.normal(k_add, (batch, 2), jnp.float32)

    # b_tile=16 -> grid of 2 batch tiles (exercises the batch grid at small shapes).
    out = branch_cnn_forward(
        x, additional_features, params, num_classes=num_classes, b_tile=16)
    out = jax.block_until_ready(out)

    ref = _reference_forward(x, additional_features, params, num_classes)
    assert out.shape == (batch, num_classes), out.shape
    max_err = float(jnp.max(jnp.abs(out - ref)))
    # bf16 matmul operands + approx reciprocal in Mish -> compare loosely vs f32 ref.
    assert jnp.allclose(out, ref, atol=5e-2, rtol=5e-2), max_err

    print("KERNEL_OK")
</pallas_src>

<mosaic_0001>
module attributes {stable_mosaic.version = 11 : i64} {
  func.func @branch_cnn_kernel(%arg0: i32, %arg1: memref<16x128xf32, #tpu.memory_space<vmem>>, %arg2: memref<128x1024xbf16, #tpu.memory_space<vmem>>, %arg3: memref<1x1024xf32, #tpu.memory_space<vmem>>, %arg4: memref<1024x512xbf16, #tpu.memory_space<vmem>>, %arg5: memref<1x512xf32, #tpu.memory_space<vmem>>, %arg6: memref<512x256xbf16, #tpu.memory_space<vmem>>, %arg7: memref<1x256xf32, #tpu.memory_space<vmem>>, %arg8: memref<256x128xbf16, #tpu.memory_space<vmem>>, %arg9: memref<1x128xf32, #tpu.memory_space<vmem>>, %arg10: memref<16x128xf32, #tpu.memory_space<vmem>>) attributes {dimension_semantics = [#tpu.dimension_semantics<parallel>], iteration_bounds = array<i64: 2>, scalar_prefetch = 0 : i64, scratch_operands = 0 : i64, tpu.core_type = #tpu.core_type<tc>, window_params = [{transform_indices = @transform_0, window_bounds = array<i64: 16, 128>}, {pipeline_mode = #tpu.pipeline_mode<synchronous>, transform_indices = @transform_1, window_bounds = array<i64: 128, 1024>}, {pipeline_mode = #tpu.pipeline_mode<synchronous>, transform_indices = @transform_2, window_bounds = array<i64: 1, 1024>}, {pipeline_mode = #tpu.pipeline_mode<synchronous>, transform_indices = @transform_3, window_bounds = array<i64: 1024, 512>}, {pipeline_mode = #tpu.pipeline_mode<synchronous>, transform_indices = @transform_4, window_bounds = array<i64: 1, 512>}, {pipeline_mode = #tpu.pipeline_mode<synchronous>, transform_indices = @transform_5, window_bounds = array<i64: 512, 256>}, {pipeline_mode = #tpu.pipeline_mode<synchronous>, transform_indices = @transform_6, window_bounds = array<i64: 1, 256>}, {pipeline_mode = #tpu.pipeline_mode<synchronous>, transform_indices = @transform_7, window_bounds = array<i64: 256, 128>}, {pipeline_mode = #tpu.pipeline_mode<synchronous>, transform_indices = @transform_8, window_bounds = array<i64: 1, 128>}, {transform_indices = @transform_9, window_bounds = array<i64: 16, 128>}]} {
    %c0 = arith.constant 0 : index
    %c0_0 = arith.constant 0 : index
    %0 = vector.load %arg1[%c0, %c0_0] : memref<16x128xf32, #tpu.memory_space<vmem>>, vector<16x128xf32>
    %1 = arith.truncf %0 : vector<16x128xf32> to vector<16x128xbf16>
    %c0_1 = arith.constant 0 : index
    %c0_2 = arith.constant 0 : index
    %2 = vector.load %arg2[%c0_1, %c0_2] : memref<128x1024xbf16, #tpu.memory_space<vmem>>, vector<128x1024xbf16>
    %cst = arith.constant dense<0.000000e+00> : vector<16x1024xf32>
    %3 = tpu.matmul %1, %2, %cst {dimension_numbers = #tpu.dot_dimension_numbers<[1], [0], [0], [1], [0, 0, 1, 1], [], []>} : vector<16x128xbf16>, vector<128x1024xbf16>, vector<16x1024xf32> -> vector<16x1024xf32>
    %c0_3 = arith.constant 0 : index
    %c0_4 = arith.constant 0 : index
    %4 = vector.load %arg3[%c0_3, %c0_4] : memref<1x1024xf32, #tpu.memory_space<vmem>>, vector<1x1024xf32>
    %5 = vector.broadcast %4 : vector<1x1024xf32> to vector<16x1024xf32>
    %6 = arith.addf %3, %5 : vector<16x1024xf32>
    %7 = math.absf %6 : vector<16x1024xf32>
    %cst_5 = arith.constant 0.000000e+00 : f32
    %8 = vector.broadcast %cst_5 : f32 to vector<16x1024xf32>
    %9 = arith.subf %8, %7 : vector<16x1024xf32>
    %10 = math.exp %9 : vector<16x1024xf32>
    %cst_6 = arith.constant 2.000000e+00 : f32
    %11 = vector.broadcast %cst_6 : f32 to vector<16x1024xf32>
    %12 = arith.mulf %11, %10 : vector<16x1024xf32>
    %cst_7 = arith.constant 1.000000e+00 : f32
    %13 = vector.broadcast %cst_7 : f32 to vector<16x1024xf32>
    %14 = arith.addf %13, %12 : vector<16x1024xf32>
    %cst_8 = arith.constant 2.000000e+00 : f32
    %15 = vector.broadcast %cst_8 : f32 to vector<16x1024xf32>
    %16 = arith.mulf %15, %10 : vector<16x1024xf32>
    %17 = arith.mulf %16, %10 : vector<16x1024xf32>
    %18 = arith.addf %14, %17 : vector<16x1024xf32>
    %cst_9 = arith.constant 2.000000e+00 : f32
    %19 = vector.broadcast %cst_9 : f32 to vector<16x1024xf32>
    %20 = arith.addf %10, %19 : vector<16x1024xf32>
    %21 = arith.mulf %10, %20 : vector<16x1024xf32>
    %cst_10 = arith.constant 2.000000e+00 : f32
    %22 = vector.broadcast %cst_10 : f32 to vector<16x1024xf32>
    %23 = arith.addf %21, %22 : vector<16x1024xf32>
    %cst_11 = arith.constant 0.000000e+00 : f32
    %24 = vector.broadcast %cst_11 : f32 to vector<16x1024xf32>
    %25 = arith.cmpf oge, %6, %24 : vector<16x1024xf32>
    %26 = arith.select %25, %14, %21 : vector<16x1024xi1>, vector<16x1024xf32>
    %cst_12 = arith.constant 0.000000e+00 : f32
    %27 = vector.broadcast %cst_12 : f32 to vector<16x1024xf32>
    %28 = arith.cmpf oge, %6, %27 : vector<16x1024xf32>
    %29 = arith.select %28, %18, %23 : vector<16x1024xi1>, vector<16x1024xf32>
    %30 = arith.mulf %6, %26 : vector<16x1024xf32>
    %31 = tpu.reciprocal %29 {approx = true} : vector<16x1024xf32> -> vector<16x1024xf32>
    %32 = arith.mulf %30, %31 : vector<16x1024xf32>
    %33 = arith.truncf %32 : vector<16x1024xf32> to vector<16x1024xbf16>
    %c0_13 = arith.constant 0 : index
    %c0_14 = arith.constant 0 : index
    %34 = vector.load %arg4[%c0_13, %c0_14] : memref<1024x512xbf16, #tpu.memory_space<vmem>>, vector<1024x512xbf16>
    %cst_15 = arith.constant dense<0.000000e+00> : vector<16x512xf32>
    %35 = tpu.matmul %33, %34, %cst_15 {dimension_numbers = #tpu.dot_dimension_numbers<[1], [0], [0], [1], [0, 0, 1, 1], [], []>} : vector<16x1024xbf16>, vector<1024x512xbf16>, vector<16x512xf32> -> vector<16x512xf32>
    %c0_16 = arith.constant 0 : index
    %c0_17 = arith.constant 0 : index
    %36 = vector.load %arg5[%c0_16, %c0_17] : memref<1x512xf32, #tpu.memory_space<vmem>>, vector<1x512xf32>
    %37 = vector.broadcast %36 : vector<1x512xf32> to vector<16x512xf32>
    %38 = arith.addf %35, %37 : vector<16x512xf32>
    %39 = math.absf %38 : vector<16x512xf32>
    %cst_18 = arith.constant 0.000000e+00 : f32
    %40 = vector.broadcast %cst_18 : f32 to vector<16x512xf32>
    %41 = arith.subf %40, %39 : vector<16x512xf32>
    %42 = math.exp %41 : vector<16x512xf32>
    %cst_19 = arith.constant 2.000000e+00 : f32
    %43 = vector.broadcast %cst_19 : f32 to vector<16x512xf32>
    %44 = arith.mulf %43, %42 : vector<16x512xf32>
    %cst_20 = arith.constant 1.000000e+00 : f32
    %45 = vector.broadcast %cst_20 : f32 to vector<16x512xf32>
    %46 = arith.addf %45, %44 : vector<16x512xf32>
    %cst_21 = arith.constant 2.000000e+00 : f32
    %47 = vector.broadcast %cst_21 : f32 to vector<16x512xf32>
    %48 = arith.mulf %47, %42 : vector<16x512xf32>
    %49 = arith.mulf %48, %42 : vector<16x512xf32>
    %50 = arith.addf %46, %49 : vector<16x512xf32>
    %cst_22 = arith.constant 2.000000e+00 : f32
    %51 = vector.broadcast %cst_22 : f32 to vector<16x512xf32>
    %52 = arith.addf %42, %51 : vector<16x512xf32>
    %53 = arith.mulf %42, %52 : vector<16x512xf32>
    %cst_23 = arith.constant 2.000000e+00 : f32
    %54 = vector.broadcast %cst_23 : f32 to vector<16x512xf32>
    %55 = arith.addf %53, %54 : vector<16x512xf32>
    %cst_24 = arith.constant 0.000000e+00 : f32
    %56 = vector.broadcast %cst_24 : f32 to vector<16x512xf32>
    %57 = arith.cmpf oge, %38, %56 : vector<16x512xf32>
    %58 = arith.select %57, %46, %53 : vector<16x512xi1>, vector<16x512xf32>
    %cst_25 = arith.constant 0.000000e+00 : f32
    %59 = vector.broadcast %cst_25 : f32 to vector<16x512xf32>
    %60 = arith.cmpf oge, %38, %59 : vector<16x512xf32>
    %61 = arith.select %60, %50, %55 : vector<16x512xi1>, vector<16x512xf32>
    %62 = arith.mulf %38, %58 : vector<16x512xf32>
    %63 = tpu.reciprocal %61 {approx = true} : vector<16x512xf32> -> vector<16x512xf32>
    %64 = arith.mulf %62, %63 : vector<16x512xf32>
    %65 = arith.truncf %64 : vector<16x512xf32> to vector<16x512xbf16>
    %c0_26 = arith.constant 0 : index
    %c0_27 = arith.constant 0 : index
    %66 = vector.load %arg6[%c0_26, %c0_27] : memref<512x256xbf16, #tpu.memory_space<vmem>>, vector<512x256xbf16>
    %cst_28 = arith.constant dense<0.000000e+00> : vector<16x256xf32>
    %67 = tpu.matmul %65, %66, %cst_28 {dimension_numbers = #tpu.dot_dimension_numbers<[1], [0], [0], [1], [0, 0, 1, 1], [], []>} : vector<16x512xbf16>, vector<512x256xbf16>, vector<16x256xf32> -> vector<16x256xf32>
    %c0_29 = arith.constant 0 : index
    %c0_30 = arith.constant 0 : index
    %68 = vector.load %arg7[%c0_29, %c0_30] : memref<1x256xf32, #tpu.memory_space<vmem>>, vector<1x256xf32>
    %69 = vector.broadcast %68 : vector<1x256xf32> to vector<16x256xf32>
    %70 = arith.addf %67, %69 : vector<16x256xf32>
    %71 = math.absf %70 : vector<16x256xf32>
    %cst_31 = arith.constant 0.000000e+00 : f32
    %72 = vector.broadcast %cst_31 : f32 to vector<16x256xf32>
    %73 = arith.subf %72, %71 : vector<16x256xf32>
    %74 = math.exp %73 : vector<16x256xf32>
    %cst_32 = arith.constant 2.000000e+00 : f32
    %75 = vector.broadcast %cst_32 : f32 to vector<16x256xf32>
    %76 = arith.mulf %75, %74 : vector<16x256xf32>
    %cst_33 = arith.constant 1.000000e+00 : f32
    %77 = vector.broadcast %cst_33 : f32 to vector<16x256xf32>
    %78 = arith.addf %77, %76 : vector<16x256xf32>
    %cst_34 = arith.constant 2.000000e+00 : f32
    %79 = vector.broadcast %cst_34 : f32 to vector<16x256xf32>
    %80 = arith.mulf %79, %74 : vector<16x256xf32>
    %81 = arith.mulf %80, %74 : vector<16x256xf32>
    %82 = arith.addf %78, %81 : vector<16x256xf32>
    %cst_35 = arith.constant 2.000000e+00 : f32
    %83 = vector.broadcast %cst_35 : f32 to vector<16x256xf32>
    %84 = arith.addf %74, %83 : vector<16x256xf32>
    %85 = arith.mulf %74, %84 : vector<16x256xf32>
    %cst_36 = arith.constant 2.000000e+00 : f32
    %86 = vector.broadcast %cst_36 : f32 to vector<16x256xf32>
    %87 = arith.addf %85, %86 : vector<16x256xf32>
    %cst_37 = arith.constant 0.000000e+00 : f32
    %88 = vector.broadcast %cst_37 : f32 to vector<16x256xf32>
    %89 = arith.cmpf oge, %70, %88 : vector<16x256xf32>
    %90 = arith.select %89, %78, %85 : vector<16x256xi1>, vector<16x256xf32>
    %cst_38 = arith.constant 0.000000e+00 : f32
    %91 = vector.broadcast %cst_38 : f32 to vector<16x256xf32>
    %92 = arith.cmpf oge, %70, %91 : vector<16x256xf32>
    %93 = arith.select %92, %82, %87 : vector<16x256xi1>, vector<16x256xf32>
    %94 = arith.mulf %70, %90 : vector<16x256xf32>
    %95 = tpu.reciprocal %93 {approx = true} : vector<16x256xf32> -> vector<16x256xf32>
    %96 = arith.mulf %94, %95 : vector<16x256xf32>
    %97 = arith.truncf %96 : vector<16x256xf32> to vector<16x256xbf16>
    %c0_39 = arith.constant 0 : index
    %c0_40 = arith.constant 0 : index
    %98 = vector.load %arg8[%c0_39, %c0_40] : memref<256x128xbf16, #tpu.memory_space<vmem>>, vector<256x128xbf16>
    %cst_41 = arith.constant dense<0.000000e+00> : vector<16x128xf32>
    %99 = tpu.matmul %97, %98, %cst_41 {dimension_numbers = #tpu.dot_dimension_numbers<[1], [0], [0], [1], [0, 0, 1, 1], [], []>} : vector<16x256xbf16>, vector<256x128xbf16>, vector<16x128xf32> -> vector<16x128xf32>
    %c0_42 = arith.constant 0 : index
    %c0_43 = arith.constant 0 : index
    %100 = vector.load %arg9[%c0_42, %c0_43] : memref<1x128xf32, #tpu.memory_space<vmem>>, vector<1x128xf32>
    %101 = vector.broadcast %100 : vector<1x128xf32> to vector<16x128xf32>
    %102 = arith.addf %99, %101 : vector<16x128xf32>
    %c0_44 = arith.constant 0 : index
    %c0_45 = arith.constant 0 : index
    %103 = vector.load %arg10[%c0_44, %c0_45] : memref<16x128xf32, #tpu.memory_space<vmem>>, vector<16x128xf32>
    tpu.vector_store %arg10[%c0_44, %c0_45], %102 {strides = array<i32>} : memref<16x128xf32, #tpu.memory_space<vmem>>, vector<16x128xf32>,
    return
  }
  func.func @transform_0(%arg0: i32) -> (i32, i32) {
    %c0_i32 = arith.constant 0 : i32
    %c0_i32_0 = arith.constant 0 : i32
    return %arg0, %c0_i32 : i32, i32
  }
  func.func @transform_1(%arg0: i32) -> (i32, i32) {
    %c0_i32 = arith.constant 0 : i32
    %c0_i32_0 = arith.constant 0 : i32
    %c0_i32_1 = arith.constant 0 : i32
    return %c0_i32, %c0_i32_0 : i32, i32
  }
  func.func @transform_2(%arg0: i32) -> (i32, i32) {
    %c0_i32 = arith.constant 0 : i32
    %c0_i32_0 = arith.constant 0 : i32
    %c0_i32_1 = arith.constant 0 : i32
    return %c0_i32, %c0_i32_0 : i32, i32
  }
  func.func @transform_3(%arg0: i32) -> (i32, i32) {
    %c0_i32 = arith.constant 0 : i32
    %c0_i32_0 = arith.constant 0 : i32
    %c0_i32_1 = arith.constant 0 : i32
    return %c0_i32, %c0_i32_0 : i32, i32
  }
  func.func @transform_4(%arg0: i32) -> (i32, i32) {
    %c0_i32 = arith.constant 0 : i32
    %c0_i32_0 = arith.constant 0 : i32
    %c0_i32_1 = arith.constant 0 : i32
    return %c0_i32, %c0_i32_0 : i32, i32
  }
  func.func @transform_5(%arg0: i32) -> (i32, i32) {
    %c0_i32 = arith.constant 0 : i32
    %c0_i32_0 = arith.constant 0 : i32
    %c0_i32_1 = arith.constant 0 : i32
    return %c0_i32, %c0_i32_0 : i32, i32
  }
  func.func @transform_6(%arg0: i32) -> (i32, i32) {
    %c0_i32 = arith.constant 0 : i32
    %c0_i32_0 = arith.constant 0 : i32
    %c0_i32_1 = arith.constant 0 : i32
    return %c0_i32, %c0_i32_0 : i32, i32
  }
  func.func @transform_7(%arg0: i32) -> (i32, i32) {
    %c0_i32 = arith.constant 0 : i32
    %c0_i32_0 = arith.constant 0 : i32
    %c0_i32_1 = arith.constant 0 : i32
    return %c0_i32, %c0_i32_0 : i32, i32
  }
  func.func @transform_8(%arg0: i32) -> (i32, i32) {
    %c0_i32 = arith.constant 0 : i32
    %c0_i32_0 = arith.constant 0 : i32
    %c0_i32_1 = arith.constant 0 : i32
    return %c0_i32, %c0_i32_0 : i32, i32
  }
  func.func @transform_9(%arg0: i32) -> (i32, i32) {
    %c0_i32 = arith.constant 0 : i32
    %c0_i32_0 = arith.constant 0 : i32
    return %arg0, %c0_i32 : i32, i32
  }
}

</mosaic_0001>

<bundles_post_ra>
// kernel: branch_cnn_forward.1
= control target key start
LH: loop header
LB: loop body
LE: loop exit
PB: predicated region body
PF: predicated region fallthrough
CT: control target
= control target key end

     0   :  { %s5196_s30 = smov 0   ;;  %s6853_s0 = inlined_call_operand.vmem [shape: f32[32,128], index: 0, kind: input, shape index: {}]   ;;  %s6854_s1 = inlined_call_operand.vmem [shape: bf16[128,1024], index: 1, kind: input, shape index: {}]   ;;  %s6855_s2 = inlined_call_operand.vmem [shape: f32[1,1024], index: 2, kind: input, shape index: {}]   ;;  %s6856_s3 = inlined_call_operand.vmem [shape: bf16[1024,512], index: 3, kind: input, shape index: {}]   ;;  %s6857_s4 = inlined_call_operand.vmem [shape: f32[1,512], index: 4, kind: input, shape index: {}]   ;;  %s6858_s5 = inlined_call_operand.vmem [shape: bf16[512,256], index: 5, kind: input, shape index: {}]   ;;  %s6859_s6 = inlined_call_operand.vmem [shape: f32[1,256], index: 6, kind: input, shape index: {}]   ;;  %s6860_s7 = inlined_call_operand.vmem [shape: bf16[256,128], index: 7, kind: input, shape index: {}]   ;;  %s6861_s8 = inlined_call_operand.vmem [shape: f32[1,128], index: 8, kind: input, shape index: {}]   ;;  %s6862_s9 = inlined_call_operand.vmem [shape: f32[32,128], index: 9, kind: output, shape index: {}]  }
   0x1 LB: > { %s4046_s10 = sadd.s32 4294967295, %s5143_s30   ;;  %p4050_p0 = scmp.ge.s32.totalorder %s5143_s30, 1  ;;  %s5143_s30 = sphi %s5196_s30, %s19_s30  }
   0x2   : > { %p288_p1 = scmp.lt.s32.totalorder %s5143_s30, 3 }
   0x4   : > { %p289_p2 = pnand %p4050_p0, %p288_p1 }
   0x5   : > { %v340_v0 = vld [vmem:[%s6854_s1] sm:$0xff] (!%p289_p2)  ;;  %v5145_v6 = vmov (!%p289_p2), 0   ;;  %s5238_s12 = sshll.u32 (!%p289_p2), %s4046_s10, 1  ;;  %v342_v18 = vld [vmem:[%s6854_s1 + $0x10] sm:$0xff] (!%p289_p2)  ;;  %v341_v49 = vld [vmem:[%s6854_s1 + $0x8] sm:$0xff] (!%p289_p2) }
   0x6   : > { %292 = sbr.rel (%p289_p2) target bundleno = 1303 (0x517), region = 56  ;;  %v344_v1 = vld [vmem:[%s6854_s1 + $0x20] sm:$0xff] (!%p289_p2)  ;;  %798 = vmatprep.mubr.bf16.mxu1 (!%p289_p2), %v5145_v6  ;;  %884 = vmatprep.mubr.bf16.mxu0 (!%p289_p2), %v5145_v6  ;;  %v346_v19 = vld [vmem:[%s6854_s1 + $0x30] sm:$0xff] (!%p289_p2)  ;;  %p325_p3 = scmp.lt.s32.totalorder (!%p289_p2), %s5238_s12, 3  ;;  %v345_v54 = vld [vmem:[%s6854_s1 + $0x28] sm:$0xff] (!%p289_p2) }
   0x7   : > { %v348_v2 = vld [vmem:[%s6854_s1 + $0x40] sm:$0xff] (!%p289_p2)  ;;  %v4056_v3 = vcombine.high (!%p289_p2), %v340_v0, %v344_v1  ;;  %v4055_v4 = vcombine.low (!%p289_p2), %v340_v0, %v344_v1  ;;  %v4060_v21 = vcombine.high (!%p289_p2), %v342_v18, %v346_v19  ;;  %v4059_v22 = vcombine.low (!%p289_p2), %v342_v18, %v346_v19  ;;  %v350_v23 = vld [vmem:[%s6854_s1 + $0x50] sm:$0xff] (!%p289_p2)  ;;  %v349_v59 = vld [vmem:[%s6854_s1 + $0x48] sm:$0xff] (!%p289_p2) }
   0x8   : > { %v352_v5 = vld [vmem:[%s6854_s1 + $0x60] sm:$0xff] (!%p289_p2)  ;;  %v354_v24 = vld [vmem:[%s6854_s1 + $0x70] sm:$0xff] (!%p289_p2)  ;;  %v4058_v61 = vcombine.high (!%p289_p2), %v341_v49, %v345_v54  ;;  %v353_v62 = vld [vmem:[%s6854_s1 + $0x68] sm:$0xff] (!%p289_p2) }
   0x9   : > { %v4064_v7 = vcombine.high (!%p289_p2), %v348_v2, %v352_v5  ;;  %v356_v8 = vld [vmem:[%s6854_s1 + $0x80] sm:$0xff] (!%p289_p2)  ;;  %766 = vmatprep.subr.bf16.mxu1 (!%p289_p2), %v4056_v3  ;;  %v4063_v10 = vcombine.low (!%p289_p2), %v348_v2, %v352_v5  ;;  %v4068_v26 = vcombine.high (!%p289_p2), %v350_v23, %v354_v24  ;;  %v358_v27 = vld [vmem:[%s6854_s1 + $0x90] sm:$0xff] (!%p289_p2)  ;;  %852 = vmatprep.subr.bf16.mxu0 (!%p289_p2), %v4060_v21  ;;  %v377_v21 = vld [vmem:[%s6854_s1 + $0x128] sm:$0xff] (!%p289_p2) }
   0xa   : > { %v360_v9 = vld [vmem:[%s6854_s1 + $0xa0] sm:$0xff] (!%p289_p2)  ;;  %767 = vmatpush1.bf16.msra.mxu1 (!%p289_p2), %v4055_v4  ;;  %v362_v28 = vld [vmem:[%s6854_s1 + $0xb0] sm:$0xff] (!%p289_p2)  ;;  %853 = vmatpush1.bf16.msra.mxu0 (!%p289_p2), %v4059_v22  ;;  %v4067_v31 = vcombine.low (!%p289_p2), %v350_v23, %v354_v24  ;;  %v4057_v3 = vcombine.low (!%p289_p2), %v341_v49, %v345_v54  ;;  %v357_v4 = vld [vmem:[%s6854_s1 + $0x88] sm:$0xff] (!%p289_p2)  ;;  %v4066_v5 = vcombine.high (!%p289_p2), %v349_v59, %v353_v62 }
   0xb   : > { %768 = vmatprep.subr.bf16.mxu1 (!%p289_p2), %v4064_v7  ;;  %v4072_v11 = vcombine.high (!%p289_p2), %v356_v8, %v360_v9  ;;  %v364_v12 = vld [vmem:[%s6854_s1 + $0xc0] sm:$0xff] (!%p289_p2)  ;;  %v4071_v14 = vcombine.low (!%p289_p2), %v356_v8, %v360_v9  ;;  %854 = vmatprep.subr.bf16.mxu0 (!%p289_p2), %v4068_v26  ;;  %v4076_v33 = vcombine.high (!%p289_p2), %v358_v27, %v362_v28  ;;  %v366_v35 = vld [vmem:[%s6854_s1 + $0xd0] sm:$0xff] (!%p289_p2)  ;;  %v381_v26 = vld [vmem:[%s6854_s1 + $0x148] sm:$0xff] (!%p289_p2) }
   0xc   : > { %v368_v13 = vld [vmem:[%s6854_s1 + $0xe0] sm:$0xff] (!%p289_p2)  ;;  %v370_v36 = vld [vmem:[%s6854_s1 + $0xf0] sm:$0xff] (!%p289_p2)  ;;  %v4075_v39 = vcombine.low (!%p289_p2), %v358_v27, %v362_v28  ;;  %v385_v27 = vld [vmem:[%s6854_s1 + $0x168] sm:$0xff] (!%p289_p2) }
   0xd   : > { %v4080_v15 = vcombine.high %v364_v12, %v368_v13  ;;  %v372_v16 = vld [vmem:[%s6854_s1 + $0x100] sm:$0xff]  ;;  %v4079_v20 = vcombine.low %v364_v12, %v368_v13  ;;  %s6864_s12 = smov (!%p325_p3, %s5238_s12), 3  ;;  %v4084_v41 = vcombine.high %v366_v35, %v370_v36  ;;  %v374_v44 = vld [vmem:[%s6854_s1 + $0x110] sm:$0xff]  ;;  %v4083_v47 = vcombine.low %v366_v35, %v370_v36  ;;  %v365_v13 = vld [vmem:[%s6854_s1 + $0xc8] sm:$0xff] }
   0xe   : > { %769 = vmatpush1.bf16.msra.mxu1 %v4063_v10  ;;  %v376_v17 = vld [vmem:[%s6854_s1 + $0x120] sm:$0xff]  ;;  %855 = vmatpush1.bf16.msra.mxu0 %v4067_v31  ;;  %v378_v45 = vld [vmem:[%s6854_s1 + $0x130] sm:$0xff]  ;;  %s4052_s25 = sshll.u32 %s6864_s12, 3  ;;  %v361_v10 = vld [vmem:[%s6854_s1 + $0xa8] sm:$0xff]  ;;  %v4065_v12 = vcombine.low %v349_v59, %v353_v62 }
   0xf   : > { %770 = vmatprep.subr.bf16.mxu1 %v4072_v11  ;;  %v4088_v25 = vcombine.high %v372_v16, %v376_v17  ;;  %v380_v29 = vld [vmem:[%s6854_s1 + $0x140] sm:$0xff]  ;;  %v4087_v32 = vcombine.low %v372_v16, %v376_v17  ;;  %856 = vmatprep.subr.bf16.mxu0 %v4076_v33  ;;  %v4092_v50 = vcombine.high %v374_v44, %v378_v45  ;;  %s328_s11 = scalar_lea.vmem %s6853_s0, %s4052_s25  ;;  %v382_v52 = vld [vmem:[%s6854_s1 + $0x150] sm:$0xff]  ;;  %v393_v33 = vld [vmem:[%s6854_s1 + $0x1a8] sm:$0xff]  ;;  %s334_s13 = scalar_lea.vmem %s6862_s9, %s4052_s25 }
  0x10   : > { %v384_v30 = vld [vmem:[%s6854_s1 + $0x160] sm:$0xff]  ;;  %v386_v53 = vld [vmem:[%s6854_s1 + $0x170] sm:$0xff]  ;;  %v4091_v55 = vcombine.low %v374_v44, %v378_v45  ;;  %v338_v58 = vld [vmem:[%s328_s11 + $0x8] sm:$0xff]  ;;  %v4074_v16 = vcombine.high %v357_v4, %v361_v10  ;;  %v4073_v19 = vcombine.low %v357_v4, %v361_v10 }
  0x11   : > { %v4096_v34 = vcombine.high %v380_v29, %v384_v30  ;;  %v388_v37 = vld [vmem:[%s6854_s1 + $0x180] sm:$0xff]  ;;  %v4095_v40 = vcombine.low %v380_v29, %v384_v30  ;;  %v4100_v60 = vcombine.high %v382_v52, %v386_v53  ;;  %v390_v63 = vld [vmem:[%s6854_s1 + $0x190] sm:$0xff]  ;;  %v4099_v2 = vcombine.low %v382_v52, %v386_v53  ;;  %v343_v44 = vld [vmem:[%s6854_s1 + $0x18] sm:$0xff] }
  0x12   : > { %771 = vmatpush1.bf16.msra.mxu1 %v4071_v14  ;;  %v392_v38 = vld [vmem:[%s6854_s1 + $0x1a0] sm:$0xff]  ;;  %857 = vmatpush1.bf16.msra.mxu0 %v4075_v39  ;;  %v394_v0 = vld [vmem:[%s6854_s1 + $0x1b0] sm:$0xff]  ;;  %v369_v14 = vld [vmem:[%s6854_s1 + $0xe8] sm:$0xff] }
  0x13   : > { %772 = vmatprep.subr.bf16.mxu1 %v4080_v15  ;;  %v4104_v42 = vcombine.high %v388_v37, %v392_v38  ;;  %v396_v43 = vld [vmem:[%s6854_s1 + $0x1c0] sm:$0xff]  ;;  %v4103_v48 = vcombine.low %v388_v37, %v392_v38  ;;  %858 = vmatprep.subr.bf16.mxu0 %v4084_v41  ;;  %v4108_v7 = vcombine.high %v390_v63, %v394_v0  ;;  %v398_v8 = vld [vmem:[%s6854_s1 + $0x1d0] sm:$0xff]  ;;  %v397_v38 = vld [vmem:[%s6854_s1 + $0x1c8] sm:$0xff] }
  0x14   : > { %v400_v46 = vld [vmem:[%s6854_s1 + $0x1e0] sm:$0xff]  ;;  %v402_v9 = vld [vmem:[%s6854_s1 + $0x1f0] sm:$0xff]  ;;  %v4107_v11 = vcombine.low %v390_v63, %v394_v0  ;;  %v4082_v22 = vcombine.high %v365_v13, %v369_v14  ;;  %v4097_v37 = vcombine.low %v381_v26, %v385_v27  ;;  %v401_v39 = vld [vmem:[%s6854_s1 + $0x1e8] sm:$0xff] }
  0x15   : > { %v4112_v51 = vcombine.high %v396_v43, %v400_v46  ;;  %v4111_v56 = vcombine.low %v396_v43, %v400_v46  ;;  %v337_v57 = vld [vmem:[%s328_s11] sm:$0xff]  ;;  %v4116_v15 = vcombine.high %v398_v8, %v402_v9  ;;  %v4115_v18 = vcombine.low %v398_v8, %v402_v9  ;;  %v347_v45 = vld [vmem:[%s6854_s1 + $0x38] sm:$0xff] }
  0x16   : > { %773 = vmatpush1.bf16.msra.mxu1 %v4079_v20  ;;  %859 = vmatpush1.bf16.msra.mxu0 %v4083_v47  ;;  %v5324_v1 = vpack.c.bf16 %v338_v58, %v337_v57  ;;  %v4531_v17 = vld [vmem:[%s6856_s3 + $0x4] ss:$16 sps:$4 sm:$0xff]   ;;  %v373_v20 = vld [vmem:[%s6854_s1 + $0x108] sm:$0xff]  ;;  %v4529_v23 = vld [vmem:[%s6856_s3] ss:$16 sps:$4 sm:$0xff]   ;;  %v4114_v46 = vcombine.high %v397_v38, %v401_v39  ;;  %v4061_v52 = vcombine.low %v343_v44, %v347_v45 }
  0x17   : > { %774 = vmatprep.subr.bf16.mxu1 %v4088_v25  ;;  %860 = vmatprep.subr.bf16.mxu0 %v4092_v50  ;;  %v4537_v24 = vld [vmem:[%s6856_s3 + $0x24] ss:$16 sps:$4 sm:$0xff]   ;;  %v4081_v25 = vcombine.low %v365_v13, %v369_v14  ;;  %v4090_v28 = vcombine.high %v373_v20, %v377_v21  ;;  %v4535_v29 = vld [vmem:[%s6856_s3 + $0x20] ss:$16 sps:$4 sm:$0xff]   ;;  %v4089_v31 = vcombine.low %v373_v20, %v377_v21  ;;  %v351_v49 = vld [vmem:[%s6854_s1 + $0x58] sm:$0xff] }
  0x18   : > { %v4543_v30 = vld [vmem:[%s6856_s3 + $0x44] ss:$16 sps:$4 sm:$0xff]   ;;  %v4541_v35 = vld [vmem:[%s6856_s3 + $0x40] ss:$16 sps:$4 sm:$0xff]   ;;  %v355_v50 = vld [vmem:[%s6854_s1 + $0x78] sm:$0xff] }
  0x19   : > { %v4549_v36 = vld [vmem:[%s6856_s3 + $0x64] ss:$16 sps:$4 sm:$0xff]   ;;  %v4547_v41 = vld [vmem:[%s6856_s3 + $0x60] ss:$16 sps:$4 sm:$0xff]   ;;  %v359_v53 = vld [vmem:[%s6854_s1 + $0x98] sm:$0xff] }
  0x1a   : > { %775 = vmatpush1.bf16.msra.mxu1 %v4087_v32  ;;  %861 = vmatpush1.bf16.msra.mxu0 %v4091_v55  ;;  %v389_v32 = vld [vmem:[%s6854_s1 + $0x188] sm:$0xff]  ;;  %v4553_v47 = vld [vmem:[%s6856_s3 + $0x80] ss:$16 sps:$4 sm:$0xff]   ;;  %v363_v54 = vld [vmem:[%s6854_s1 + $0xb8] sm:$0xff]  ;;  %v4070_v55 = vcombine.high %v351_v49, %v355_v50 }
  0x1b   : > { %776 = vmatprep.subr.bf16.mxu1 %v4096_v34  ;;  %862 = vmatprep.subr.bf16.mxu0 %v4100_v60  ;;  %v4098_v34 = vcombine.high %v381_v26, %v385_v27  ;;  %v4105_v43 = vcombine.low %v389_v32, %v393_v33  ;;  %v367_v57 = vld [vmem:[%s6854_s1 + $0xd8] sm:$0xff]  ;;  %v4078_v59 = vcombine.high %v359_v53, %v363_v54  ;;  %v4559_v27 = vld [vmem:[%s6856_s3 + $0xa0] ss:$16 sps:$4 sm:$0xff]  }
  0x1c   : > { %v371_v58 = vld [vmem:[%s6854_s1 + $0xf8] sm:$0xff]  ;;  %v4077_v60 = vcombine.low %v359_v53, %v363_v54  ;;  %v4603_v53 = vld [vmem:[%s6856_s3 + $0x184] ss:$16 sps:$4 sm:$0xff]  }
  0x1d   : > { %v379_v62 = vld [vmem:[%s6854_s1 + $0x138] sm:$0xff]  ;;  %v4086_v63 = vcombine.high %v367_v57, %v371_v58  ;;  %v4085_v0 = vcombine.low %v367_v57, %v371_v58  ;;  %v4609_v57 = vld [vmem:[%s6856_s3 + $0x1a4] ss:$16 sps:$4 sm:$0xff]  }
  0x1e   : > { %777 = vmatpush1.bf16.msra.mxu1 %v4095_v40  ;;  %863 = vmatpush1.bf16.msra.mxu0 %v4099_v2  ;;  %v4106_v40 = vcombine.high %v389_v32, %v393_v33  ;;  %v387_v2 = vld [vmem:[%s6854_s1 + $0x178] sm:$0xff]  ;;  %v4573_v33 = vld [vmem:[%s6856_s3 + $0xe4] ss:$16 sps:$4 sm:$0xff]  }
  0x1f   : > { %778 = vmatprep.subr.bf16.mxu1 %v4104_v42  ;;  %864 = vmatprep.subr.bf16.mxu0 %v4108_v7  ;;  %v4555_v42 = vld [vmem:[%s6856_s3 + $0x84] ss:$16 sps:$4 sm:$0xff]   ;;  %v395_v7 = vld [vmem:[%s6854_s1 + $0x1b8] sm:$0xff] }
  0x20   : > { %v399_v10 = vld [vmem:[%s6854_s1 + $0x1d8] sm:$0xff] }
  0x21   : > { %v4546_v20 = vld [vmem:[%s6856_s3 + $0x4c] ss:$16 sps:$4 sm:$0xff]   ;;  %v4544_v21 = vld [vmem:[%s6856_s3 + $0x48] ss:$16 sps:$4 sm:$0xff]  }
  0x22   : > { %779 = vmatpush1.bf16.msra.mxu1 %v4103_v48  ;;  %865 = vmatpush1.bf16.msra.mxu0 %v4107_v11  ;;  %v4113_v48 = vcombine.low %v397_v38, %v401_v39  ;;  %v403_v11 = vld [vmem:[%s6854_s1 + $0x1f8] sm:$0xff]  ;;  %v4577_v39 = vld [vmem:[%s6856_s3 + $0x100] ss:$16 sps:$4 sm:$0xff]  }
  0x23   : > { %780 = vmatprep.subr.bf16.mxu1 %v4112_v51  ;;  %866 = vmatprep.subr.bf16.mxu0 %v4116_v15  ;;  %v4062_v51 = vcombine.high %v343_v44, %v347_v45  ;;  %v4118_v14 = vcombine.high %v399_v10, %v403_v11  ;;  %v4534_v15 = vld [vmem:[%s6856_s3 + $0xc] ss:$16 sps:$4 sm:$0xff]   ;;  %v4568_v32 = vld [vmem:[%s6856_s3 + $0xc8] ss:$16 sps:$4 sm:$0xff]   ;;  %v4591_v45 = vld [vmem:[%s6856_s3 + $0x144] ss:$16 sps:$4 sm:$0xff]  }
  0x24   : > { %v4564_v26 = vld [vmem:[%s6856_s3 + $0xac] ss:$16 sps:$4 sm:$0xff]   ;;  %v4586_v44 = vld [vmem:[%s6856_s3 + $0x128] ss:$16 sps:$4 sm:$0xff]  }
  0x25   : > { %v4582_v38 = vld [vmem:[%s6856_s3 + $0x10c] ss:$16 sps:$4 sm:$0xff]  }
  0x26   : > { %781 = vmatpush1.bf16.msra.mxu1 %v4111_v56  ;;  %867 = vmatpush1.bf16.msra.mxu0 %v4115_v18  ;;  %v4069_v56 = vcombine.low %v351_v49, %v355_v50  ;;  %v4540_v18 = vld [vmem:[%s6856_s3 + $0x2c] ss:$16 sps:$4 sm:$0xff]   ;;  %v4597_v49 = vld [vmem:[%s6856_s3 + $0x164] ss:$16 sps:$4 sm:$0xff]  }
  0x27   : > { %809 = vmatprep.subr.bf16.mxu1 %v4058_v61  ;;  %2776 = vmatprep.subr.bf16.mxu0 %v4531_v17  ;;  %v375_v61 = vld [vmem:[%s6854_s1 + $0x118] sm:$0xff] }
  0x28   : > { %v4093_v4 = vcombine.low %v375_v61, %v379_v62  ;;  %v4532_v17 = vld [vmem:[%s6856_s3 + $0x8] ss:$16 sps:$4 sm:$0xff]   ;;  %v4600_v50 = vld [vmem:[%s6856_s3 + $0x16c] ss:$16 sps:$4 sm:$0xff]  }
  0x29   : > { %799 = vmatmul.mubr.bf16.vlgmr.msra.gmra.mrb[0].mxu1 %v5324_v1  ;;  %885 = vmatmul.mubr.bf16.vlgmr.msra.gmra.mrb[0].mxu0 %v5324_v1  ;;  %v4606_v54 = vld [vmem:[%s6856_s3 + $0x18c] ss:$16 sps:$4 sm:$0xff]  }
  0x2a   : > { %810 = vmatpush1.bf16.msra.mxu1 %v4057_v3  ;;  %841 = vmatprep.mubr.bf16.mxu1 %v5145_v6  ;;  %v4094_v3 = vcombine.high %v375_v61, %v379_v62  ;;  %v4612_v58 = vld [vmem:[%s6856_s3 + $0x1ac] ss:$16 sps:$4 sm:$0xff]   ;;  %v4615_v61 = vld [vmem:[%s6856_s3 + $0x1c4] ss:$16 sps:$4 sm:$0xff]  }
  0x2b   : > { %811 = vmatprep.subr.bf16.mxu1 %v4066_v5  ;;  %2777 = vmatpush1.bf16.msra.mxu0 %v4529_v23  ;;  %v391_v5 = vld [vmem:[%s6854_s1 + $0x198] sm:$0xff] }
  0x2c   : > { %2778 = vmatprep.subr.bf16.mxu0 %v4537_v24  ;;  %v4109_v13 = vcombine.low %v391_v5, %v395_v7  ;;  %v4558_v23 = vld [vmem:[%s6856_s3 + $0x8c] ss:$16 sps:$4 sm:$0xff]   ;;  %v4556_v24 = vld [vmem:[%s6856_s3 + $0x88] ss:$16 sps:$4 sm:$0xff]  }
  0x2d   : > { %v4618_v62 = vld [vmem:[%s6856_s3 + $0x1cc] ss:$16 sps:$4 sm:$0xff]  }
  0x2e   : > { %812 = vmatpush1.bf16.msra.mxu1 %v4065_v12  ;;  %v4110_v12 = vcombine.high %v391_v5, %v395_v7  ;;  %v4627_v5 = vld [vmem:[%s6856_s3 + $0x204] ss:$16 sps:$4 sm:$0xff]   ;;  %v4630_v7 = vld [vmem:[%s6856_s3 + $0x20c] ss:$16 sps:$4 sm:$0xff]  }
  0x2f   : > { %813 = vmatprep.subr.bf16.mxu1 %v4074_v16  ;;  %2779 = vmatpush1.bf16.msra.mxu0 %v4535_v29  ;;  %v4117_v16 = vcombine.low %v399_v10, %v403_v11  ;;  %v4567_v29 = vld [vmem:[%s6856_s3 + $0xc4] ss:$16 sps:$4 sm:$0xff]  }
  0x30   : > { %2780 = vmatprep.subr.bf16.mxu0 %v4543_v30  ;;  %v4570_v30 = vld [vmem:[%s6856_s3 + $0xcc] ss:$16 sps:$4 sm:$0xff]   ;;  %v5628_v11 = vld [vmem:[%s6855_s2] sm:$0xff] }
  0x32   : > { %814 = vmatpush1.bf16.msra.mxu1 %v4073_v19  ;;  %v4538_v19 = vld [vmem:[%s6856_s3 + $0x28] ss:$16 sps:$4 sm:$0xff]  }
  0x33   : > { %815 = vmatprep.subr.bf16.mxu1 %v4082_v22  ;;  %2781 = vmatpush1.bf16.msra.mxu0 %v4541_v35  ;;  %v4552_v22 = vld [vmem:[%s6856_s3 + $0x6c] ss:$16 sps:$4 sm:$0xff]   ;;  %v4571_v35 = vld [vmem:[%s6856_s3 + $0xe0] ss:$16 sps:$4 sm:$0xff]  }
  0x34   : > { %2782 = vmatprep.subr.bf16.mxu0 %v4549_v36  ;;  %v4574_v36 = vld [vmem:[%s6856_s3 + $0xe8] ss:$16 sps:$4 sm:$0xff]  }
  0x36   : > { %816 = vmatpush1.bf16.msra.mxu1 %v4081_v25  ;;  %v4561_v25 = vld [vmem:[%s6856_s3 + $0xa4] ss:$16 sps:$4 sm:$0xff]  }
  0x37   : > { %817 = vmatprep.subr.bf16.mxu1 %v4090_v28  ;;  %2783 = vmatpush1.bf16.msra.mxu0 %v4547_v41  ;;  %v4562_v28 = vld [vmem:[%s6856_s3 + $0xa8] ss:$16 sps:$4 sm:$0xff]   ;;  %v4585_v41 = vld [vmem:[%s6856_s3 + $0x124] ss:$16 sps:$4 sm:$0xff]  }
  0x38   : > { %2784 = vmatprep.subr.bf16.mxu0 %v4555_v42  ;;  %v4588_v42 = vld [vmem:[%s6856_s3 + $0x12c] ss:$16 sps:$4 sm:$0xff]  }
  0x3a   : > { %818 = vmatpush1.bf16.msra.mxu1 %v4089_v31  ;;  %v4565_v31 = vld [vmem:[%s6856_s3 + $0xc0] ss:$16 sps:$4 sm:$0xff]  }
  0x3b   : > { %819 = vmatprep.subr.bf16.mxu1 %v4098_v34  ;;  %2785 = vmatpush1.bf16.msra.mxu0 %v4553_v47  ;;  %v4576_v34 = vld [vmem:[%s6856_s3 + $0xec] ss:$16 sps:$4 sm:$0xff]   ;;  %v4589_v47 = vld [vmem:[%s6856_s3 + $0x140] ss:$16 sps:$4 sm:$0xff]  }
  0x3c   : > { %2786 = vmatprep.subr.bf16.mxu0 %v4561_v25 }
  0x3e   : > { %820 = vmatpush1.bf16.msra.mxu1 %v4097_v37  ;;  %v4579_v37 = vld [vmem:[%s6856_s3 + $0x104] ss:$16 sps:$4 sm:$0xff]  }
  0x3f   : > { %821 = vmatprep.subr.bf16.mxu1 %v4106_v40  ;;  %2787 = vmatpush1.bf16.msra.mxu0 %v4559_v27  ;;  %v4580_v40 = vld [vmem:[%s6856_s3 + $0x108] ss:$16 sps:$4 sm:$0xff]  }
  0x40   : > { %2788 = vmatprep.subr.bf16.mxu0 %v4567_v29 }
  0x42   : > { %822 = vmatpush1.bf16.msra.mxu1 %v4105_v43  ;;  %v4583_v43 = vld [vmem:[%s6856_s3 + $0x120] ss:$16 sps:$4 sm:$0xff]  }
  0x43   : > { %823 = vmatprep.subr.bf16.mxu1 %v4114_v46  ;;  %2789 = vmatpush1.bf16.msra.mxu0 %v4565_v31  ;;  %v4594_v46 = vld [vmem:[%s6856_s3 + $0x14c] ss:$16 sps:$4 sm:$0xff]  }
  0x44   : > { %2790 = vmatprep.subr.bf16.mxu0 %v4573_v33 }
  0x46   : > { %824 = vmatpush1.bf16.msra.mxu1 %v4113_v48  ;;  %v4592_v48 = vld [vmem:[%s6856_s3 + $0x148] ss:$16 sps:$4 sm:$0xff]  }
  0x47   : > { %895 = vmatprep.subr.bf16.mxu1 %v4062_v51  ;;  %2791 = vmatpush1.bf16.msra.mxu0 %v4571_v35  ;;  %v4595_v51 = vld [vmem:[%s6856_s3 + $0x160] ss:$16 sps:$4 sm:$0xff]  }
  0x48   : > { %2792 = vmatprep.subr.bf16.mxu0 %v4579_v37 }
  0x49   : > { %842 = vmatmul.mubr.bf16.vlgmr.msra.gmra.mrb[4].mxu1 %v5324_v1 }
  0x4a   : > { %896 = vmatpush1.bf16.msra.mxu1 %v4061_v52  ;;  %927 = vmatprep.mubr.bf16.mxu1 %v5145_v6  ;;  %v383_v6 = vld [vmem:[%s6854_s1 + $0x158] sm:$0xff] }
  0x4b   : > { %897 = vmatprep.subr.bf16.mxu1 %v4070_v55  ;;  %v4102_v8 = vcombine.high %v383_v6, %v387_v2  ;;  %v4101_v9 = vcombine.low %v383_v6, %v387_v2  ;;  %2793 = vmatpush1.bf16.msra.mxu0 %v4577_v39  ;;  %v4598_v52 = vld [vmem:[%s6856_s3 + $0x168] ss:$16 sps:$4 sm:$0xff]   ;;  %v4601_v55 = vld [vmem:[%s6856_s3 + $0x180] ss:$16 sps:$4 sm:$0xff]   ;;  %v4621_v6 = vld [vmem:[%s6856_s3 + $0x1e4] ss:$16 sps:$4 sm:$0xff]  }
  0x4c   : > { %2794 = vmatprep.subr.bf16.mxu0 %v4585_v41  ;;  %v4624_v2 = vld [vmem:[%s6856_s3 + $0x1ec] ss:$16 sps:$4 sm:$0xff]  }
  0x4e   : > { %898 = vmatpush1.bf16.msra.mxu1 %v4069_v56  ;;  %v4604_v56 = vld [vmem:[%s6856_s3 + $0x188] ss:$16 sps:$4 sm:$0xff]  }
  0x4f   : > { %899 = vmatprep.subr.bf16.mxu1 %v4078_v59  ;;  %2795 = vmatpush1.bf16.msra.mxu0 %v4583_v43  ;;  %v4607_v59 = vld [vmem:[%s6856_s3 + $0x1a0] ss:$16 sps:$4 sm:$0xff]  }
  0x50   : > { %2796 = vmatprep.subr.bf16.mxu0 %v4591_v45 }
  0x52   : > { %900 = vmatpush1.bf16.msra.mxu1 %v4077_v60  ;;  %v4610_v60 = vld [vmem:[%s6856_s3 + $0x1a8] ss:$16 sps:$4 sm:$0xff]  }
  0x53   : > { %901 = vmatprep.subr.bf16.mxu1 %v4086_v63  ;;  %2797 = vmatpush1.bf16.msra.mxu0 %v4589_v47  ;;  %v4613_v63 = vld [vmem:[%s6856_s3 + $0x1c0] ss:$16 sps:$4 sm:$0xff]  }
  0x54   : > { %2798 = vmatprep.subr.bf16.mxu0 %v4597_v49 }
  0x56   : > { %902 = vmatpush1.bf16.msra.mxu1 %v4085_v0  ;;  %v4616_v0 = vld [vmem:[%s6856_s3 + $0x1c8] ss:$16 sps:$4 sm:$0xff]  }
  0x57   : > { %903 = vmatprep.subr.bf16.mxu1 %v4094_v3  ;;  %2799 = vmatpush1.bf16.msra.mxu0 %v4595_v51  ;;  %v4619_v3 = vld [vmem:[%s6856_s3 + $0x1e0] ss:$16 sps:$4 sm:$0xff]  }
  0x58   : > { %2800 = vmatprep.subr.bf16.mxu0 %v4603_v53 }
  0x5a   : > { %904 = vmatpush1.bf16.msra.mxu1 %v4093_v4  ;;  %v4622_v4 = vld [vmem:[%s6856_s3 + $0x1e8] ss:$16 sps:$4 sm:$0xff]  }
  0x5b   : > { %905 = vmatprep.subr.bf16.mxu1 %v4102_v8  ;;  %2801 = vmatpush1.bf16.msra.mxu0 %v4601_v55  ;;  %v406_v8 = vlaneseq }
  0x5c   : > { %2802 = vmatprep.subr.bf16.mxu0 %v4609_v57 }
  0x5e   : > { %906 = vmatpush1.bf16.msra.mxu1 %v4101_v9  ;;  %v5620_v9 = vshrl.u32 %v406_v8, 7 }
  0x5f   : > { %907 = vmatprep.subr.bf16.mxu1 %v4110_v12  ;;  %2803 = vmatpush1.bf16.msra.mxu0 %v4607_v59 }
  0x60   : > { %2804 = vmatprep.subr.bf16.mxu0 %v4615_v61  ;;  %v5623_v10 = vsub.s32 0, %v5620_v9  ;;  %v5631_v12 = vsub.s32 1, %v5620_v9  ;;  %v428_v27 = vsub.s32 5, %v5620_v9  ;;  %v420_v55 = vsub.s32 3, %v5620_v9 }
  0x62   : > { %908 = vmatpush1.bf16.msra.mxu1 %v4109_v13  ;;  %v409_v13 = vrot.slane %v5628_v11, %v5623_v10 }
  0x63   : > { %909 = vmatprep.subr.bf16.mxu1 %v4118_v14  ;;  %2805 = vmatpush1.bf16.msra.mxu0 %v4613_v63  ;;  %v413_v14 = vrot.slane %v5628_v11, %v5631_v12 }
  0x64   : > { %2806 = vmatprep.subr.bf16.mxu0 %v4621_v6 }
  0x66   : > { %910 = vmatpush1.bf16.msra.mxu1 %v4117_v16 }
  0x67   : > { %2948 = vmatprep.subr.bf16.mxu1 %v4534_v15  ;;  %2807 = vmatpush1.bf16.msra.mxu0 %v4619_v3 }
  0x68   : > { %2819 = vmatprep.subr.bf16.mxu0 %v4627_v5 }
  0x69   : > { %928 = vmatmul.mubr.bf16.vlgmr.msra.gmra.mrb[8].mxu1 %v5324_v1  ;;  %v4550_v1 = vld [vmem:[%s6856_s3 + $0x68] ss:$16 sps:$4 sm:$0xff]  }
  0x6a   : > { %2949 = vmatpush1.bf16.msra.mxu1 %v4532_v17 }
  0x6b   : > { %2950 = vmatprep.subr.bf16.mxu1 %v4540_v18 }
  0x6e   : > { %2951 = vmatpush1.bf16.msra.mxu1 %v4538_v19 }
  0x6f   : > { %2952 = vmatprep.subr.bf16.mxu1 %v4546_v20 }
  0x72   : > { %2953 = vmatpush1.bf16.msra.mxu1 %v4544_v21 }
  0x73   : > { %2954 = vmatprep.subr.bf16.mxu1 %v4552_v22 }
  0x76   : > { %2955 = vmatpush1.bf16.msra.mxu1 %v4550_v1 }
  0x77   : > { %2956 = vmatprep.subr.bf16.mxu1 %v4558_v23 }
  0x7a   : > { %2957 = vmatpush1.bf16.msra.mxu1 %v4556_v24  ;;  %v424_v24 = vsub.s32 4, %v5620_v9 }
  0x7b   : > { %2958 = vmatprep.subr.bf16.mxu1 %v4564_v26 }
  0x7e   : > { %2959 = vmatpush1.bf16.msra.mxu1 %v4562_v28 }
  0x7f   : > { %2960 = vmatprep.subr.bf16.mxu1 %v4570_v30 }
  0x82   : > { %2961 = vmatpush1.bf16.msra.mxu1 %v4568_v32 }
  0x83   : > { %2962 = vmatprep.subr.bf16.mxu1 %v4576_v34  ;;  %v425_v34 = vrot.slane %v5628_v11, %v424_v24 }
  0x86   : > { %2963 = vmatpush1.bf16.msra.mxu1 %v4574_v36  ;;  %v429_v36 = vrot.slane %v5628_v11, %v428_v27 }
  0x87   : > { %2964 = vmatprep.subr.bf16.mxu1 %v4582_v38 }
  0x8a   : > { %2965 = vmatpush1.bf16.msra.mxu1 %v4580_v40 }
  0x8b   : > { %2966 = vmatprep.subr.bf16.mxu1 %v4588_v42 }
  0x8e   : > { %2967 = vmatpush1.bf16.msra.mxu1 %v4586_v44 }
  0x8f   : > { %2968 = vmatprep.subr.bf16.mxu1 %v4594_v46 }
  0x92   : > { %2969 = vmatpush1.bf16.msra.mxu1 %v4592_v48 }
  0x93   : > { %2970 = vmatprep.subr.bf16.mxu1 %v4600_v50 }
  0x96   : > { %2971 = vmatpush1.bf16.msra.mxu1 %v4598_v52 }
  0x97   : > { %2972 = vmatprep.subr.bf16.mxu1 %v4606_v54  ;;  %v416_v54 = vsub.s32 2, %v5620_v9 }
  0x9a   : > { %2973 = vmatpush1.bf16.msra.mxu1 %v4604_v56 }
  0x9b   : > { %2974 = vmatprep.subr.bf16.mxu1 %v4612_v58 }
  0x9e   : > { %2975 = vmatpush1.bf16.msra.mxu1 %v4610_v60 }
  0x9f   : > { %2976 = vmatprep.subr.bf16.mxu1 %v4618_v62 }
  0xa2   : > { %2977 = vmatpush1.bf16.msra.mxu1 %v4616_v0 }
  0xa3   : > { %2978 = vmatprep.subr.bf16.mxu1 %v4624_v2 }
  0xa6   : > { %2979 = vmatpush1.bf16.msra.mxu1 %v4622_v4 }
  0xa7   : > { %2991 = vmatprep.subr.bf16.mxu1 %v4630_v7 }
  0xfc   : > { %v800_v15 = vpop.f32.mrb[0].mxu1  ;;  %v886_v38 = vpop.f32.mrb[0].mxu0 }
  0xfd   : > { %v5637_v16 = vadd.f32 %v800_v15, %v409_v13  ;;  %v802_v17 = vpop.f32.mrb[1].mxu1  ;;  %v5653_v39 = vadd.f32 %v886_v38, %v425_v34  ;;  %v888_v40 = vpop.f32.mrb[1].mxu0 }
  0xfe   : > { %v5639_v18 = vadd.f32 %v802_v17, %v413_v14  ;;  %v804_v19 = vpop.f32.mrb[2].mxu1  ;;  %v5655_v41 = vadd.f32 %v888_v40, %v429_v36  ;;  %v890_v42 = vpop.f32.mrb[2].mxu0  ;;  %v421_v40 = vrot.slane %v5628_v11, %v420_v55 }
  0xff   : > { %v938_v20 = vand.u32 2147483647, %v5637_v16  ;;  %v5642_v21 = vadd.f32 %v804_v19, %v409_v13  ;;  %v806_v22 = vpop.f32.mrb[3].mxu1  ;;  %v942_v43 = vand.u32 2147483647, %v5653_v39  ;;  %v5658_v44 = vadd.f32 %v890_v42, %v425_v34  ;;  %v892_v45 = vpop.f32.mrb[3].mxu0 }
 0x100   : > { %v939_v1 = vand.u32 2147483647, %v5639_v18  ;;  %v5645_v23 = vadd.f32 %v806_v22, %v413_v14  ;;  %v943_v46 = vand.u32 2147483647, %v5655_v41  ;;  %v5661_v47 = vadd.f32 %v892_v45, %v429_v36 }
 0x101   : > { %v954_v25 = vsub.f32 0.0, %v938_v20  ;;  %v946_v26 = vand.u32 2147483647, %v5642_v21  ;;  %v958_v48 = vsub.f32 0.0, %v942_v43  ;;  %v950_v50 = vand.u32 2147483647, %v5658_v44 }
 0x102   : > { %v955_v28 = vsub.f32 0.0, %v939_v1  ;;  %v947_v29 = vand.u32 2147483647, %v5645_v23  ;;  %v959_v49 = vsub.f32 0.0, %v943_v46  ;;  %v951_v51 = vand.u32 2147483647, %v5661_v47 }
 0x103   : > { %v970_v30 = vmul.f32 1.442695, %v954_v25  ;;  %v962_v31 = vsub.f32 0.0, %v946_v26  ;;  %v978_v52 = vmul.f32 1.442695, %v958_v48  ;;  %v966_v63 = vsub.f32 0.0, %v950_v50 }
 0x104   : > { %v972_v32 = vmul.f32 1.442695, %v955_v28  ;;  %v963_v33 = vsub.f32 0.0, %v947_v29  ;;  %v980_v59 = vmul.f32 1.442695, %v959_v49  ;;  %v967_v0 = vsub.f32 0.0, %v951_v51 }
 0x105   : > { %5025 = vpow2.f32 %v970_v30  ;;  %v986_v35 = vmul.f32 1.442695, %v962_v31  ;;  %vm1114_vm0 = vcmp.ge.f32.partialorder %v5637_v16, 0.0  ;;  %v417_v1 = vrot.slane %v5628_v11, %v416_v54 }
 0x106   : > { %5027 = vpow2.f32 %v972_v32  ;;  %v988_v37 = vmul.f32 1.442695, %v963_v33  ;;  %v994_v27 = vmul.f32 1.442695, %v966_v63  ;;  %vm1115_vm1 = vcmp.ge.f32.partialorder %v5639_v18, 0.0 }
 0x107   : > { %5029 = vpow2.f32 %v986_v35  ;;  %vm1122_vm2 = vcmp.ge.f32.partialorder %v5642_v21, 0.0  ;;  %v996_v32 = vmul.f32 1.442695, %v967_v0  ;;  %vm1123_vm3 = vcmp.ge.f32.partialorder %v5645_v23, 0.0 }
 0x108   : > { %5031 = vpow2.f32 %v988_v37  ;;  %vm1118_vm4 = vcmp.ge.f32.partialorder %v5653_v39, 0.0  ;;  %vm1126_vm5 = vcmp.ge.f32.partialorder %v5658_v44, 0.0  ;;  %vm1119_vm6 = vcmp.ge.f32.partialorder %v5655_v41, 0.0 }
 0x109   : > { %5033 = vpow2.f32 %v978_v52  ;;  %vm1127_vm9 = vcmp.ge.f32.partialorder %v5661_v47, 0.0 }
 0x10a   : > { %5035 = vpow2.f32 %v980_v59 }
 0x10f   : > { %v5026_v53 = vpop.eup %5025 }
 0x110   : > { %v5028_v56 = vpop.eup %5027  ;;  %v1002_v57 = vmul.f32 2.0, %v5026_v53  ;;  %v1066_v58 = vadd.f32 2.0, %v5026_v53 }
 0x111   : > { %v5030_v60 = vpop.eup %5029  ;;  %v1003_v61 = vmul.f32 2.0, %v5028_v56  ;;  %v1067_v62 = vadd.f32 2.0, %v5028_v56 }
 0x112   : > { %v1018_v6 = vadd.f32 1.0, %v1002_v57  ;;  %v1034_v2 = vmul.f32 %v5026_v53, %v1002_v57  ;;  %v1082_v3 = vmul.f32 %v5026_v53, %v1066_v58  ;;  %v1010_v4 = vmul.f32 2.0, %v5030_v60  ;;  %v5032_v14 = vpop.eup %5031 }
 0x113   : > { %v1019_v5 = vadd.f32 1.0, %v1003_v61  ;;  %v1035_v7 = vmul.f32 %v5028_v56, %v1003_v61  ;;  %v1083_v8 = vmul.f32 %v5028_v56, %v1067_v62  ;;  %v1074_v13 = vadd.f32 2.0, %v5030_v60  ;;  %v5034_v37 = vpop.eup %5033 }
 0x114   : > { %v1050_v15 = vadd.f32 %v1034_v2, %v1018_v6  ;;  %v1098_v17 = vadd.f32 2.0, %v1082_v3  ;;  %v1026_v19 = vadd.f32 1.0, %v1010_v4  ;;  %v1042_v25 = vmul.f32 %v5030_v60, %v1010_v4  ;;  %v5036_v53 = vpop.eup %5035 }
 0x115   : > { %v1051_v20 = vadd.f32 %v1035_v7, %v1019_v5  ;;  %v1099_v22 = vadd.f32 2.0, %v1083_v8  ;;  %v1090_v26 = vmul.f32 %v5030_v60, %v1074_v13  ;;  %v1011_v28 = vmul.f32 2.0, %v5032_v14 }
 0x116   : > { %v1146_v24 = vsel %vm1114_vm0, %v1050_v15, %v1098_v17  ;;  %v1075_v29 = vadd.f32 2.0, %v5032_v14  ;;  %v1058_v30 = vadd.f32 %v1042_v25, %v1026_v19  ;;  %v1006_v46 = vmul.f32 2.0, %v5034_v37 }
 0x117   : > { %5037 = vrcp.f32 %v1146_v24  ;;  %v1106_v31 = vadd.f32 2.0, %v1090_v26  ;;  %v1147_v33 = vsel %vm1115_vm1, %v1051_v20, %v1099_v22  ;;  %v1027_v34 = vadd.f32 1.0, %v1011_v28 }
 0x118   : > { %v1043_v35 = vmul.f32 %v5032_v14, %v1011_v28  ;;  %v1091_v36 = vmul.f32 %v5032_v14, %v1075_v29  ;;  %5039 = vpow2.f32 %v994_v27  ;;  %v1070_v48 = vadd.f32 2.0, %v5034_v37 }
 0x119   : > { %v1154_v38 = vsel %vm1122_vm2, %v1058_v30, %v1106_v31  ;;  %v1130_v49 = vsel %vm1114_vm0, %v1018_v6, %v1082_v3  ;;  %v1131_v56 = vsel %vm1115_vm1, %v1019_v5, %v1083_v8  ;;  %v1138_v57 = vsel %vm1122_vm2, %v1026_v19, %v1090_v26 }
 0x11a   : > { %5041 = vrcp.f32 %v1154_v38  ;;  %v1059_v42 = vadd.f32 %v1043_v35, %v1027_v34  ;;  %v1107_v43 = vadd.f32 2.0, %v1091_v36  ;;  %v1139_v60 = vsel %vm1123_vm3, %v1027_v34, %v1091_v36 }
 0x11b   : > { %5043 = vrcp.f32 %v1147_v33  ;;  %v5701_v0 = vadd.f32 1.0, %v1006_v46  ;;  %v1038_v3 = vmul.f32 %v5034_v37, %v1006_v46  ;;  %v5706_v4 = vmul.f32 %v5034_v37, %v1070_v48 }
 0x11c   : > { %v843_v45 = vpop.f32.mrb[4].mxu1  ;;  %v1155_v50 = vsel %vm1123_vm3, %v1059_v42, %v1107_v43  ;;  %5045 = vpow2.f32 %v996_v32  ;;  %v1162_v5 = vmul.f32 %v1130_v49, %v5637_v16  ;;  %v1007_v13 = vmul.f32 2.0, %v5036_v53 }
 0x11d   : > { %v5687_v51 = vadd.f32 %v843_v45, %v417_v1  ;;  %v845_v52 = vpop.f32.mrb[5].mxu1  ;;  %5047 = vrcp.f32 %v1155_v50  ;;  %v1163_v15 = vmul.f32 %v1131_v56, %v5639_v18  ;;  %v1170_v17 = vmul.f32 %v1138_v57, %v5642_v21  ;;  %v4628_v57 = vld [vmem:[%s6856_s3 + $0x208] ss:$16 sps:$4 sm:$0xff]  }
 0x11e   : > { %v5693_v58 = vadd.f32 %v845_v52, %v421_v40  ;;  %v847_v59 = vpop.f32.mrb[6].mxu1  ;;  %v1171_v22 = vmul.f32 %v1139_v60, %v5645_v23  ;;  %v1071_v25 = vadd.f32 2.0, %v5036_v53  ;;  %v1054_v28 = vadd.f32 %v1038_v3, %v5701_v0 }
 0x11f   : > { %v940_v61 = vand.u32 2147483647, %v5687_v51  ;;  %v5699_v62 = vadd.f32 %v847_v59, %v417_v1  ;;  %v849_v63 = vpop.f32.mrb[7].mxu1  ;;  %v1102_v29 = vadd.f32 2.0, %v5706_v4  ;;  %v5716_v21 = vadd.f32 1.0, %v1007_v13 }
 0x120   : > { %v941_v6 = vand.u32 2147483647, %v5693_v58  ;;  %v5704_v2 = vadd.f32 %v849_v63, %v421_v40  ;;  %v1039_v34 = vmul.f32 %v5036_v53, %v1007_v13  ;;  %v5718_v36 = vmul.f32 %v5036_v53, %v1071_v25  ;;  %v4625_v53 = vld [vmem:[%s6856_s3 + $0x200] ss:$16 sps:$4 sm:$0xff]   ;;  %v4633_v63 = vld [vmem:[%s6856_s3 + $0x224] ss:$16 sps:$4 sm:$0xff]  }
 0x121   : > { %v956_v7 = vsub.f32 0.0, %v940_v61  ;;  %v948_v8 = vand.u32 2147483647, %v5699_v62  ;;  %v5038_v14 = vpop.eup %5037  ;;  %v1150_v46 = vsel %vm1118_vm4, %v1054_v28, %v1102_v29  ;;  %vm1116_vm7 = vcmp.ge.f32.partialorder %v5687_v51, 0.0 }
 0x122   : > { %v957_v19 = vsub.f32 0.0, %v941_v6  ;;  %v949_v20 = vand.u32 2147483647, %v5704_v2  ;;  %v5040_v26 = vpop.eup %5039  ;;  %v1194_v31 = vmul.f32 %v5038_v14, %v1162_v5  ;;  %v1055_v59 = vadd.f32 %v1039_v34, %v5716_v21  ;;  %v4636_v6 = vld [vmem:[%s6856_s3 + $0x22c] ss:$16 sps:$4 sm:$0xff]  }
 0x123   : > { %v974_v1 = vmul.f32 1.442695, %v956_v7  ;;  %v964_v24 = vsub.f32 0.0, %v948_v8  ;;  %v1014_v37 = vmul.f32 2.0, %v5040_v26  ;;  %v1078_v38 = vadd.f32 2.0, %v5040_v26 }
 0x124   : > { %v976_v27 = vmul.f32 1.442695, %v957_v19  ;;  %v965_v16 = vsub.f32 0.0, %v949_v20  ;;  %v5042_v30 = vpop.eup %5041  ;;  %v1103_v60 = vadd.f32 2.0, %v5718_v36  ;;  %vm1117_vm8 = vcmp.ge.f32.partialorder %v5693_v58, 0.0 }
 0x125   : > { %5049 = vpow2.f32 %v974_v1  ;;  %v990_v18 = vmul.f32 1.442695, %v964_v24  ;;  %v5044_v32 = vpop.eup %5043  ;;  %v1202_v33 = vmul.f32 %v5042_v30, %v1170_v17  ;;  %v1030_v48 = vadd.f32 1.0, %v1014_v37  ;;  %v4631_v14 = vld [vmem:[%s6856_s3 + $0x220] ss:$16 sps:$4 sm:$0xff]  }
 0x126   : > { %5051 = vpow2.f32 %v976_v27  ;;  %v992_v23 = vmul.f32 1.442695, %v965_v16  ;;  %v5046_v35 = vpop.eup %5045  ;;  %v1195_v43 = vmul.f32 %v5044_v32, %v1163_v15  ;;  %v1046_v49 = vmul.f32 %v5040_v26, %v1014_v37  ;;  %v4634_v19 = vld [vmem:[%s6856_s3 + $0x228] ss:$16 sps:$4 sm:$0xff]   ;;  %v4639_v20 = vld [vmem:[%s6856_s3 + $0x244] ss:$16 sps:$4 sm:$0xff]  }
 0x127   : > { %5053 = vpow2.f32 %v990_v18  ;;  %v5048_v40 = vpop.eup %5047  ;;  %v1210_v42 = vpack.c.bf16 %v1202_v33, %v1194_v31  ;;  %v1094_v50 = vmul.f32 %v5040_v26, %v1078_v38  ;;  %v1015_v52 = vmul.f32 2.0, %v5046_v35  ;;  %v4642_v27 = vld [vmem:[%s6856_s3 + $0x24c] ss:$16 sps:$4 sm:$0xff]   ;;  %v4637_v34 = vld [vmem:[%s6856_s3 + $0x240] ss:$16 sps:$4 sm:$0xff]  }
 0x128   : > { %v1203_v45 = vmul.f32 %v5048_v40, %v1171_v22  ;;  %5055 = vpow2.f32 %v992_v23  ;;  %v1079_v61 = vadd.f32 2.0, %v5046_v35  ;;  %v1062_v3 = vadd.f32 %v1046_v49, %v1030_v48 }
 0x129   : > { %v1110_v5 = vadd.f32 2.0, %v1094_v50  ;;  %5057 = vrcp.f32 %v1150_v46  ;;  %v5738_v7 = vadd.f32 1.0, %v1015_v52  ;;  %v1047_v8 = vmul.f32 %v5046_v35, %v1015_v52 }
 0x12a   : > { %v1211_v56 = vpack.c.bf16 %v1203_v45, %v1195_v43  ;;  %v5740_v13 = vmul.f32 %v5046_v35, %v1079_v61  ;;  %vm1124_vm10 = vcmp.ge.f32.partialorder %v5699_v62, 0.0  ;;  %v1134_v22 = vsel %vm1118_vm4, %v5701_v0, %v5706_v4  ;;  %v4645_v43 = vld [vmem:[%s6856_s3 + $0x264] ss:$16 sps:$4 sm:$0xff]  }
 0x12b   : > { %v1158_v15 = vsel %vm1126_vm5, %v1062_v3, %v1110_v5  ;;  %v1151_v1 = vsel %vm1119_vm6, %v1055_v59, %v1103_v60  ;;  %v1142_v16 = vsel %vm1126_vm5, %v1030_v48, %v1094_v50  ;;  %v432_v28 = vsub.s32 6, %v5620_v9  ;;  %v4648_v50 = vld [vmem:[%s6856_s3 + $0x26c] ss:$16 sps:$4 sm:$0xff]  }
 0x12c   : > { %2808 = vmatprep.mubr.bf16.mxu0 %v1211_v56  ;;  %2980 = vmatprep.mubr.bf16.mxu1 %v1211_v56  ;;  %5059 = vrcp.f32 %v1158_v15  ;;  %v1063_v30 = vadd.f32 %v1047_v8, %v5738_v7  ;;  %v1111_v31 = vadd.f32 2.0, %v5740_v13  ;;  %vm1125_vm11 = vcmp.ge.f32.partialorder %v5704_v2, 0.0  ;;  %v4643_v8 = vld [vmem:[%s6856_s3 + $0x260] ss:$16 sps:$4 sm:$0xff]  }
 0x12d   : > { %2809 = vmatmul.mubr.bf16.vlgmr.msra.gmra.mrb[4].mxu0 %v1210_v42  ;;  %2981 = vmatmul.mubr.bf16.vlgmr.msra.gmra.mrb[12].mxu1 %v1210_v42  ;;  %v4640_v42 = vld [vmem:[%s6856_s3 + $0x248] ss:$16 sps:$4 sm:$0xff]   ;;  %v436_v52 = vsub.s32 7, %v5620_v9  ;;  %5061 = vrcp.f32 %v1151_v1  ;;  %v433_v15 = vrot.slane %v5628_v11, %v432_v28 }
 0x12e   : > { %2820 = vmatpush1.bf16.msra.mxu0 %v4625_v53  ;;  %2992 = vmatpush1.bf16.msra.mxu1 %v4628_v57  ;;  %v1166_v57 = vmul.f32 %v1134_v22, %v5653_v39  ;;  %v4646_v39 = vld [vmem:[%s6856_s3 + $0x268] ss:$16 sps:$4 sm:$0xff]  }
 0x12f   : > { %v5050_v17 = vpop.eup %5049  ;;  %2821 = vmatprep.subr.bf16.mxu0 %v4633_v63  ;;  %2993 = vmatprep.subr.bf16.mxu1 %v4636_v6  ;;  %v1174_v63 = vmul.f32 %v1142_v16, %v5658_v44  ;;  %v437_v22 = vrot.slane %v5628_v11, %v436_v52  ;;  %v4658_v52 = vld [vmem:[%s6856_s3 + $0x2a8] ss:$16 sps:$4 sm:$0xff]  }
 0x130   : > { %v5052_v24 = vpop.eup %5051  ;;  %v1004_v25 = vmul.f32 2.0, %v5050_v17  ;;  %v1068_v26 = vadd.f32 2.0, %v5050_v17 }
 0x131   : > { %v5054_v29 = vpop.eup %5053  ;;  %v1005_v0 = vmul.f32 2.0, %v5052_v24  ;;  %v1069_v4 = vadd.f32 2.0, %v5052_v24 }
 0x132   : > { %v5771_v18 = vadd.f32 1.0, %v1004_v25  ;;  %v1036_v32 = vmul.f32 %v5050_v17, %v1004_v25  ;;  %v5773_v33 = vmul.f32 %v5050_v17, %v1068_v26  ;;  %v1012_v23 = vmul.f32 2.0, %v5054_v29  ;;  %2822 = vmatpush1.bf16.msra.mxu0 %v4631_v14  ;;  %2994 = vmatpush1.bf16.msra.mxu1 %v4634_v19  ;;  %v5056_v45 = vpop.eup %5055  ;;  %v4651_v19 = vld [vmem:[%s6856_s3 + $0x284] ss:$16 sps:$4 sm:$0xff]  }
 0x133   : > { %v5779_v35 = vadd.f32 1.0, %v1005_v0  ;;  %v1037_v37 = vmul.f32 %v5052_v24, %v1005_v0  ;;  %v5781_v38 = vmul.f32 %v5052_v24, %v1069_v4  ;;  %v1076_v40 = vadd.f32 2.0, %v5054_v29  ;;  %2823 = vmatprep.subr.bf16.mxu0 %v4639_v20  ;;  %2995 = vmatprep.subr.bf16.mxu1 %v4642_v27  ;;  %v5058_v6 = vpop.eup %5057  ;;  %v4654_v20 = vld [vmem:[%s6856_s3 + $0x28c] ss:$16 sps:$4 sm:$0xff]   ;;  %v4649_v4 = vld [vmem:[%s6856_s3 + $0x280] ss:$16 sps:$4 sm:$0xff]  }
 0x134   : > { %v1052_v46 = vadd.f32 %v1036_v32, %v5771_v18  ;;  %v1100_v48 = vadd.f32 2.0, %v5773_v33  ;;  %v5791_v49 = vadd.f32 1.0, %v1012_v23  ;;  %v1044_v60 = vmul.f32 %v5054_v29, %v1012_v23  ;;  %v4660_v32 = vld [vmem:[%s6856_s3 + $0x2ac] ss:$16 sps:$4 sm:$0xff]  }
 0x135   : > { %v1053_v56 = vadd.f32 %v1037_v37, %v5779_v35  ;;  %v1101_v53 = vadd.f32 2.0, %v5781_v38  ;;  %v5802_v61 = vmul.f32 %v5054_v29, %v1076_v40  ;;  %v1013_v3 = vmul.f32 2.0, %v5056_v45 }
 0x136   : > { %v1148_v59 = vsel %vm1116_vm7, %v1052_v46, %v1100_v48  ;;  %v1077_v5 = vadd.f32 2.0, %v5056_v45  ;;  %2824 = vmatpush1.bf16.msra.mxu0 %v4637_v34  ;;  %2996 = vmatpush1.bf16.msra.mxu1 %v4640_v42  ;;  %v1159_v14 = vsel %vm1127_vm9, %v1063_v30, %v1111_v31  ;;  %v1060_v44 = vadd.f32 %v1044_v60, %v5791_v49  ;;  %v5060_v1 = vpop.eup %5059  ;;  %v4652_v30 = vld [vmem:[%s6856_s3 + $0x288] ss:$16 sps:$4 sm:$0xff]   ;;  %v4657_v31 = vld [vmem:[%s6856_s3 + $0x2a4] ss:$16 sps:$4 sm:$0xff]  }
 0x137   : > { %5063 = vrcp.f32 %v1148_v59  ;;  %v1108_v17 = vadd.f32 2.0, %v5802_v61  ;;  %2825 = vmatprep.subr.bf16.mxu0 %v4645_v43  ;;  %2997 = vmatprep.subr.bf16.mxu1 %v4648_v50  ;;  %v1149_v24 = vsel %vm1117_vm8, %v1053_v56, %v1101_v53  ;;  %v5825_v25 = vadd.f32 1.0, %v1013_v3  ;;  %v5062_v48 = vpop.eup %5061  ;;  %v4661_v60 = vld [vmem:[%s6856_s3 + $0x2c0] ss:$16 sps:$4 sm:$0xff]  }
 0x138   : > { %v1045_v26 = vmul.f32 %v5056_v45, %v1013_v3  ;;  %v5827_v27 = vmul.f32 %v5056_v45, %v1077_v5  ;;  %v1198_v28 = vmul.f32 %v5058_v6, %v1166_v57  ;;  %v1206_v29 = vmul.f32 %v5060_v1, %v1174_v63  ;;  %v4655_v45 = vld [vmem:[%s6856_s3 + $0x2a0] ss:$16 sps:$4 sm:$0xff]   ;;  %v4663_v57 = vld [vmem:[%s6856_s3 + $0x2c4] ss:$16 sps:$4 sm:$0xff]  }
 0x139   : > { %v1156_v16 = vsel %vm1124_vm10, %v1060_v44, %v1108_v17  ;;  %5065 = vrcp.f32 %v1159_v14  ;;  %v1135_v23 = vsel %vm1119_vm6, %v5716_v21, %v5718_v36  ;;  %v1143_v46 = vsel %vm1127_vm9, %v5738_v7, %v5740_v13 }
 0x13a   : > { %5067 = vrcp.f32 %v1156_v16  ;;  %v1061_v0 = vadd.f32 %v1045_v26, %v5825_v25  ;;  %v1109_v11 = vadd.f32 2.0, %v5827_v27  ;;  %2826 = vmatpush1.bf16.msra.mxu0 %v4643_v8  ;;  %2998 = vmatpush1.bf16.msra.mxu1 %v4646_v39  ;;  %v5849_v37 = vpack.c.bf16 %v1206_v29, %v1198_v28  ;;  %v4664_v39 = vld [vmem:[%s6856_s3 + $0x2c8] ss:$16 sps:$4 sm:$0xff]  }
 0x13b   : > { %5069 = vrcp.f32 %v1149_v24  ;;  %2827 = vmatprep.subr.bf16.mxu0 %v4651_v19  ;;  %2999 = vmatprep.subr.bf16.mxu1 %v4654_v20  ;;  %v1132_v50 = vsel %vm1116_vm7, %v5771_v18, %v5773_v33  ;;  %v1167_v56 = vmul.f32 %v1135_v23, %v5655_v41  ;;  %v4666_v18 = vld [vmem:[%s6856_s3 + $0x2cc] ss:$16 sps:$4 sm:$0xff]   ;;  %v1140_v41 = vsel %vm1124_vm10, %v5791_v49, %v5802_v61 }
 0x13c   : > { %v929_v34 = vpop.f32.mrb[8].mxu1  ;;  %v1157_v40 = vsel %vm1125_vm11, %v1061_v0, %v1109_v11  ;;  %v1175_v63 = vmul.f32 %v1143_v46, %v5661_v47  ;;  %v1164_v8 = vmul.f32 %v1132_v50, %v5687_v51  ;;  %v1133_v49 = vsel %vm1117_vm8, %v5779_v35, %v5781_v38  ;;  %v4669_v47 = vld [vmem:[%s6856_s3 + $0x2e4] ss:$16 sps:$4 sm:$0xff]   ;;  %v4672_v35 = vld [vmem:[%s6856_s3 + $0x2ec] ss:$16 sps:$4 sm:$0xff]  }
 0x13d   : > { %v5853_v42 = vadd.f32 %v929_v34, %v433_v15  ;;  %v931_v43 = vpop.f32.mrb[9].mxu1  ;;  %5071 = vrcp.f32 %v1157_v40  ;;  %v1199_v61 = vmul.f32 %v5062_v48, %v1167_v56  ;;  %v1172_v19 = vmul.f32 %v1140_v41, %v5699_v62  ;;  %v4670_v11 = vld [vmem:[%s6856_s3 + $0x2e8] ss:$16 sps:$4 sm:$0xff]   ;;  %v4673_v34 = vld [vmem:[%s6856_s3 + $0x300] ss:$16 sps:$4 sm:$0xff]  }
 0x13e   : > { %v5862_v21 = vadd.f32 %v931_v43, %v437_v22  ;;  %v933_v36 = vpop.f32.mrb[10].mxu1  ;;  %2828 = vmatpush1.bf16.msra.mxu0 %v4649_v4  ;;  %3000 = vmatpush1.bf16.msra.mxu1 %v4652_v30  ;;  %v1141_v20 = vsel %vm1125_vm11, %v5825_v25, %v5827_v27  ;;  %v1165_v0 = vmul.f32 %v1133_v49, %v5693_v58  ;;  %v4667_v27 = vld [vmem:[%s6856_s3 + $0x2e0] ss:$16 sps:$4 sm:$0xff]   ;;  %v4675_v58 = vld [vmem:[%s6856_s3 + $0x304] ss:$16 sps:$4 sm:$0xff]  }
 0x13f   : > { %v944_v53 = vand.u32 2147483647, %v5853_v42  ;;  %v5873_v7 = vadd.f32 %v933_v36, %v433_v15  ;;  %v935_v13 = vpop.f32.mrb[11].mxu1  ;;  %2829 = vmatprep.subr.bf16.mxu0 %v4657_v31  ;;  %3001 = vmatprep.subr.bf16.mxu1 %v4660_v32  ;;  %v1173_v25 = vmul.f32 %v1141_v20, %v5704_v2  ;;  %v4678_v2 = vld [vmem:[%s6856_s3 + $0x30c] ss:$16 sps:$4 sm:$0xff]   ;;  %vm1120_vm12 = vcmp.ge.f32.partialorder %v5853_v42, 0.0 }
 0x140   : > { %v945_v33 = vand.u32 2147483647, %v5862_v21  ;;  %v5882_v59 = vadd.f32 %v935_v13, %v437_v22  ;;  %v4676_v43 = vld [vmem:[%s6856_s3 + $0x308] ss:$16 sps:$4 sm:$0xff]   ;;  %v4684_v46 = vld [vmem:[%s6856_s3 + $0x32c] ss:$16 sps:$4 sm:$0xff]  }
 0x141   : > { %v960_v6 = vsub.f32 0.0, %v944_v53  ;;  %v952_v3 = vand.u32 2147483647, %v5873_v7  ;;  %v5064_v5 = vpop.eup %5063  ;;  %v4679_v48 = vld [vmem:[%s6856_s3 + $0x320] ss:$16 sps:$4 sm:$0xff]   ;;  %vm1121_vm13 = vcmp.ge.f32.partialorder %v5862_v21, 0.0 }
 0x142   : > { %v961_v14 = vsub.f32 0.0, %v945_v33  ;;  %v953_v15 = vand.u32 2147483647, %v5882_v59  ;;  %2830 = vmatpush1.bf16.msra.mxu0 %v4655_v45  ;;  %3002 = vmatpush1.bf16.msra.mxu1 %v4658_v52  ;;  %v1196_v28 = vmul.f32 %v5064_v5, %v1164_v8  ;;  %v4681_v45 = vld [vmem:[%s6856_s3 + $0x324] ss:$16 sps:$4 sm:$0xff]   ;;  %vm1128_vm14 = vcmp.ge.f32.partialorder %v5873_v7, 0.0 }
 0x143   : > { %v982_v51 = vmul.f32 1.442695, %v960_v6  ;;  %v968_v44 = vsub.f32 0.0, %v952_v3  ;;  %v5066_v17 = vpop.eup %5065  ;;  %2831 = vmatprep.subr.bf16.mxu0 %v4663_v57  ;;  %3003 = vmatprep.subr.bf16.mxu1 %v4666_v18  ;;  %v4682_v50 = vld [vmem:[%s6856_s3 + $0x328] ss:$16 sps:$4 sm:$0xff]   ;;  %vm1129_vm15 = vcmp.ge.f32.partialorder %v5882_v59, 0.0 }
 0x144   : > { %v984_v38 = vmul.f32 1.442695, %v961_v14  ;;  %v969_v22 = vsub.f32 0.0, %v953_v15  ;;  %v5068_v1 = vpop.eup %5067  ;;  %v1207_v24 = vmul.f32 %v5066_v17, %v1175_v63  ;;  %v4687_v56 = vld [vmem:[%s6856_s3 + $0x344] ss:$16 sps:$4 sm:$0xff]  }
 0x145   : > { %5073 = vpow2.f32 %v982_v51  ;;  %v998_v26 = vmul.f32 1.442695, %v968_v44  ;;  %v5070_v16 = vpop.eup %5069  ;;  %v1204_v62 = vmul.f32 %v5068_v1, %v1172_v19  ;;  %v4690_v53 = vld [vmem:[%s6856_s3 + $0x34c] ss:$16 sps:$4 sm:$0xff]   ;;  %v4688_v8 = vld [vmem:[%s6856_s3 + $0x348] ss:$16 sps:$4 sm:$0xff]  }
 0x146   : > { %5075 = vpow2.f32 %v984_v38  ;;  %v1000_v29 = vmul.f32 1.442695, %v969_v22  ;;  %2832 = vmatpush1.bf16.msra.mxu0 %v4661_v60  ;;  %3004 = vmatpush1.bf16.msra.mxu1 %v4664_v39  ;;  %v5921_v4 = vpack.c.bf16 %v1207_v24, %v1199_v61  ;;  %v1197_v32 = vmul.f32 %v5070_v16, %v1165_v0  ;;  %v4685_v60 = vld [vmem:[%s6856_s3 + $0x340] ss:$16 sps:$4 sm:$0xff]   ;;  %v4693_v39 = vld [vmem:[%s6856_s3 + $0x364] ss:$16 sps:$4 sm:$0xff]  }
 0x147   : > { %5077 = vpow2.f32 %v998_v26  ;;  %v5072_v30 = vpop.eup %5071  ;;  %2833 = vmatprep.subr.bf16.mxu0 %v4669_v47  ;;  %3005 = vmatprep.subr.bf16.mxu1 %v4672_v35  ;;  %v5929_v31 = vpack.c.bf16 %v1204_v62, %v1196_v28  ;;  %v4696_v51 = vld [vmem:[%s6856_s3 + $0x36c] ss:$16 sps:$4 sm:$0xff]   ;;  %v4691_v24 = vld [vmem:[%s6856_s3 + $0x360] ss:$16 sps:$4 sm:$0xff]   ;;  %v4694_v26 = vld [vmem:[%s6856_s3 + $0x368] ss:$16 sps:$4 sm:$0xff]  }
 0x148   : > { %v1205_v23 = vmul.f32 %v5072_v30, %v1173_v25  ;;  %5079 = vpow2.f32 %v1000_v29  ;;  %v4699_v29 = vld [vmem:[%s6856_s3 + $0x384] ss:$16 sps:$4 sm:$0xff]   ;;  %v4702_v0 = vld [vmem:[%s6856_s3 + $0x38c] ss:$16 sps:$4 sm:$0xff]  }
 0x14a   : > { %2834 = vmatpush1.bf16.msra.mxu0 %v4667_v27  ;;  %3006 = vmatpush1.bf16.msra.mxu1 %v4670_v11  ;;  %v1213_v40 = vpack.c.bf16 %v1205_v23, %v1197_v32  ;;  %v4697_v32 = vld [vmem:[%s6856_s3 + $0x380] ss:$16 sps:$4 sm:$0xff]   ;;  %v4700_v23 = vld [vmem:[%s6856_s3 + $0x388] ss:$16 sps:$4 sm:$0xff]  }
 0x14b   : > { %2835 = vmatprep.subr.bf16.mxu0 %v4675_v58  ;;  %3007 = vmatprep.subr.bf16.mxu1 %v4678_v2 }
 0x14c   : > { %2851 = vmatprep.mubr.bf16.mxu0 %v1213_v40  ;;  %3023 = vmatprep.mubr.bf16.mxu1 %v1213_v40 }
 0x14e   : > { %2836 = vmatpush1.bf16.msra.mxu0 %v4673_v34  ;;  %3008 = vmatpush1.bf16.msra.mxu1 %v4676_v43  ;;  %v4705_v43 = vld [vmem:[%s6856_s3 + $0x3a4] ss:$16 sps:$4 sm:$0xff]  }
 0x14f   : > { %v5074_v36 = vpop.eup %5073  ;;  %2837 = vmatprep.subr.bf16.mxu0 %v4681_v45  ;;  %3009 = vmatprep.subr.bf16.mxu1 %v4684_v46  ;;  %v4708_v45 = vld [vmem:[%s6856_s3 + $0x3ac] ss:$16 sps:$4 sm:$0xff]  }
 0x150   : > { %v5076_v52 = vpop.eup %5075  ;;  %v1008_v13 = vmul.f32 2.0, %v5074_v36  ;;  %v1072_v57 = vadd.f32 2.0, %v5074_v36 }
 0x151   : > { %v5078_v18 = vpop.eup %5077  ;;  %v1009_v33 = vmul.f32 2.0, %v5076_v52  ;;  %v1073_v41 = vadd.f32 2.0, %v5076_v52 }
 0x152   : > { %v1024_v63 = vadd.f32 1.0, %v1008_v13  ;;  %v1040_v6 = vmul.f32 %v5074_v36, %v1008_v13  ;;  %v1088_v3 = vmul.f32 %v5074_v36, %v1072_v57  ;;  %v1016_v5 = vmul.f32 2.0, %v5078_v18  ;;  %2838 = vmatpush1.bf16.msra.mxu0 %v4679_v48  ;;  %3010 = vmatpush1.bf16.msra.mxu1 %v4682_v50  ;;  %v5080_v61 = vpop.eup %5079  ;;  %v4703_v48 = vld [vmem:[%s6856_s3 + $0x3a0] ss:$16 sps:$4 sm:$0xff]   ;;  %v4706_v50 = vld [vmem:[%s6856_s3 + $0x3a8] ss:$16 sps:$4 sm:$0xff]  }
 0x153   : > { %v5965_v14 = vadd.f32 1.0, %v1009_v33  ;;  %v1041_v15 = vmul.f32 %v5076_v52, %v1009_v33  ;;  %v1089_v49 = vmul.f32 %v5076_v52, %v1073_v41  ;;  %v1080_v47 = vadd.f32 2.0, %v5078_v18  ;;  %2839 = vmatprep.subr.bf16.mxu0 %v4687_v56  ;;  %3011 = vmatprep.subr.bf16.mxu1 %v4690_v53  ;;  %v4711_v56 = vld [vmem:[%s6856_s3 + $0x3c4] ss:$16 sps:$4 sm:$0xff]   ;;  %v4714_v53 = vld [vmem:[%s6856_s3 + $0x3cc] ss:$16 sps:$4 sm:$0xff]  }
 0x154   : > { %v1056_v44 = vadd.f32 %v1040_v6, %v1024_v63  ;;  %v1104_v17 = vadd.f32 2.0, %v1088_v3  ;;  %v1032_v19 = vadd.f32 1.0, %v1016_v5  ;;  %v1048_v22 = vmul.f32 %v5078_v18, %v1016_v5 }
 0x155   : > { %v1057_v20 = vadd.f32 %v1041_v15, %v5965_v14  ;;  %v1105_v35 = vadd.f32 2.0, %v1089_v49  ;;  %v1096_v1 = vmul.f32 %v5078_v18, %v1080_v47  ;;  %v1017_v28 = vmul.f32 2.0, %v5080_v61  ;;  %v4718_v15 = vld [vmem:[%s6856_s3 + $0x3e8] ss:$16 sps:$4 sm:$0xff]  }
 0x156   : > { %v1152_v38 = vsel %vm1120_vm12, %v1056_v44, %v1104_v17  ;;  %2840 = vmatpush1.bf16.msra.mxu0 %v4685_v60  ;;  %3012 = vmatpush1.bf16.msra.mxu1 %v4688_v8  ;;  %v1081_v62 = vadd.f32 2.0, %v5080_v61  ;;  %v1064_v25 = vadd.f32 %v1048_v22, %v1032_v19  ;;  %v1136_v46 = vsel %vm1120_vm12, %v1024_v63, %v1088_v3  ;;  %v4709_v60 = vld [vmem:[%s6856_s3 + $0x3c0] ss:$16 sps:$4 sm:$0xff]   ;;  %v4720_v3 = vld [vmem:[%s6856_s3 + $0x3ec] ss:$16 sps:$4 sm:$0xff]  }
 0x157   : > { %5081 = vrcp.f32 %v1152_v38  ;;  %v1153_v16 = vsel %vm1121_vm13, %v1057_v20, %v1105_v35  ;;  %2841 = vmatprep.subr.bf16.mxu0 %v4693_v39  ;;  %3013 = vmatprep.subr.bf16.mxu1 %v4696_v51  ;;  %v1112_v27 = vadd.f32 2.0, %v1096_v1  ;;  %v1033_v11 = vadd.f32 1.0, %v1017_v28  ;;  %v4721_v17 = vld [vmem:[%s6856_s3 + $0x400] ss:$16 sps:$4 sm:$0xff]   ;;  %v4729_v35 = vld [vmem:[%s6856_s3 + $0x424] ss:$16 sps:$4 sm:$0xff]  }
 0x158   : > { %v1049_v30 = vmul.f32 %v5080_v61, %v1017_v28  ;;  %v1097_v58 = vmul.f32 %v5080_v61, %v1081_v62  ;;  %5083 = vrcp.f32 %v1153_v16  ;;  %v1144_v52 = vsel %vm1128_vm14, %v1032_v19, %v1096_v1  ;;  %v4723_v61 = vld [vmem:[%s6856_s3 + $0x404] ss:$16 sps:$4 sm:$0xff]   ;;  %v4724_v19 = vld [vmem:[%s6856_s3 + $0x408] ss:$16 sps:$4 sm:$0xff]   ;;  %v4732_v38 = vld [vmem:[%s6856_s3 + $0x42c] ss:$16 sps:$4 sm:$0xff]  }
 0x159   : > { %v1160_v2 = vsel %vm1128_vm14, %v1064_v25, %v1112_v27  ;;  %v1168_v13 = vmul.f32 %v1136_v46, %v5853_v42  ;;  %v1137_v57 = vsel %vm1121_vm13, %v5965_v14, %v1089_v49  ;;  %v1176_v33 = vmul.f32 %v1144_v52, %v5873_v7  ;;  %v4712_v42 = vld [vmem:[%s6856_s3 + $0x3c8] ss:$16 sps:$4 sm:$0xff]   ;;  %v4717_v7 = vld [vmem:[%s6856_s3 + $0x3e4] ss:$16 sps:$4 sm:$0xff]   ;;  %v4727_v22 = vld [vmem:[%s6856_s3 + $0x420] ss:$16 sps:$4 sm:$0xff]  }
 0x15a   : > { %2842 = vmatpush1.bf16.msra.mxu0 %v4691_v24  ;;  %3014 = vmatpush1.bf16.msra.mxu1 %v4694_v26  ;;  %5085 = vrcp.f32 %v1160_v2  ;;  %v1065_v34 = vadd.f32 %v1049_v30, %v1033_v11  ;;  %v1113_v40 = vadd.f32 2.0, %v1097_v58  ;;  %v1145_v41 = vsel %vm1129_vm15, %v1033_v11, %v1097_v58  ;;  %v4730_v1 = vld [vmem:[%s6856_s3 + $0x428] ss:$16 sps:$4 sm:$0xff]   ;;  %v4735_v24 = vld [vmem:[%s6856_s3 + $0x444] ss:$16 sps:$4 sm:$0xff]  }
 0x15b   : > { %2843 = vmatprep.subr.bf16.mxu0 %v4699_v29  ;;  %3015 = vmatprep.subr.bf16.mxu1 %v4702_v0  ;;  %v1169_v63 = vmul.f32 %v1137_v57, %v5862_v21  ;;  %v1177_v39 = vmul.f32 %v1145_v41, %v5882_v59  ;;  %v4715_v21 = vld [vmem:[%s6856_s3 + $0x3e0] ss:$16 sps:$4 sm:$0xff]   ;;  %v4726_v59 = vld [vmem:[%s6856_s3 + $0x40c] ss:$16 sps:$4 sm:$0xff]   ;;  %v4736_v16 = vld [vmem:[%s6856_s3 + $0x448] ss:$16 sps:$4 sm:$0xff]  }
 0x15c   : > { %v1161_v36 = vsel %vm1129_vm15, %v1065_v34, %v1113_v40  ;;  %v4733_v26 = vld [vmem:[%s6856_s3 + $0x440] ss:$16 sps:$4 sm:$0xff]   ;;  %v4741_v28 = vld [vmem:[%s6856_s3 + $0x464] ss:$16 sps:$4 sm:$0xff]   ;;  %v4742_v29 = vld [vmem:[%s6856_s3 + $0x468] ss:$16 sps:$4 sm:$0xff]  }
 0x15d   : > { %5087 = vrcp.f32 %v1161_v36  ;;  %v4739_v62 = vld [vmem:[%s6856_s3 + $0x460] ss:$16 sps:$4 sm:$0xff]   ;;  %v4747_v0 = vld [vmem:[%s6856_s3 + $0x484] ss:$16 sps:$4 sm:$0xff]   ;;  %v4750_v25 = vld [vmem:[%s6856_s3 + $0x48c] ss:$16 sps:$4 sm:$0xff]  }
 0x15e   : > { %2844 = vmatpush1.bf16.msra.mxu0 %v4697_v32  ;;  %3016 = vmatpush1.bf16.msra.mxu1 %v4700_v23  ;;  %v4745_v27 = vld [vmem:[%s6856_s3 + $0x480] ss:$16 sps:$4 sm:$0xff]   ;;  %v4748_v11 = vld [vmem:[%s6856_s3 + $0x488] ss:$16 sps:$4 sm:$0xff]   ;;  %v4753_v30 = vld [vmem:[%s6856_s3 + $0x4a4] ss:$16 sps:$4 sm:$0xff]  }
 0x15f   : > { %2845 = vmatprep.subr.bf16.mxu0 %v4705_v43  ;;  %3017 = vmatprep.subr.bf16.mxu1 %v4708_v45  ;;  %v4756_v58 = vld [vmem:[%s6856_s3 + $0x4ac] ss:$16 sps:$4 sm:$0xff]   ;;  %v4751_v2 = vld [vmem:[%s6856_s3 + $0x4a0] ss:$16 sps:$4 sm:$0xff]   ;;  %v4754_v32 = vld [vmem:[%s6856_s3 + $0x4a8] ss:$16 sps:$4 sm:$0xff]  }
 0x160   : > { %v4759_v23 = vld [vmem:[%s6856_s3 + $0x4c4] ss:$16 sps:$4 sm:$0xff]   ;;  %v4762_v34 = vld [vmem:[%s6856_s3 + $0x4cc] ss:$16 sps:$4 sm:$0xff]   ;;  %v4757_v40 = vld [vmem:[%s6856_s3 + $0x4c0] ss:$16 sps:$4 sm:$0xff]  }
 0x161   : > { %v5082_v18 = vpop.eup %5081  ;;  %v4760_v43 = vld [vmem:[%s6856_s3 + $0x4c8] ss:$16 sps:$4 sm:$0xff]   ;;  %v4765_v45 = vld [vmem:[%s6856_s3 + $0x4e4] ss:$16 sps:$4 sm:$0xff]   ;;  %v4768_v46 = vld [vmem:[%s6856_s3 + $0x4ec] ss:$16 sps:$4 sm:$0xff]  }
 0x162   : > { %2846 = vmatpush1.bf16.msra.mxu0 %v4703_v48  ;;  %3018 = vmatpush1.bf16.msra.mxu1 %v4706_v50  ;;  %v5084_v6 = vpop.eup %5083  ;;  %v1200_v5 = vmul.f32 %v5082_v18, %v1168_v13  ;;  %v4763_v36 = vld [vmem:[%s6856_s3 + $0x4e0] ss:$16 sps:$4 sm:$0xff]   ;;  %v4766_v48 = vld [vmem:[%s6856_s3 + $0x4e8] ss:$16 sps:$4 sm:$0xff]   ;;  %v4771_v50 = vld [vmem:[%s6856_s3 + $0x504] ss:$16 sps:$4 sm:$0xff]  }
 0x163   : > { %2847 = vmatprep.subr.bf16.mxu0 %v4711_v56  ;;  %3019 = vmatprep.subr.bf16.mxu1 %v4714_v53  ;;  %v1201_v49 = vmul.f32 %v5084_v6, %v1169_v63  ;;  %v4774_v52 = vld [vmem:[%s6856_s3 + $0x50c] ss:$16 sps:$4 sm:$0xff]   ;;  %v4769_v56 = vld [vmem:[%s6856_s3 + $0x500] ss:$16 sps:$4 sm:$0xff]   ;;  %v4772_v53 = vld [vmem:[%s6856_s3 + $0x508] ss:$16 sps:$4 sm:$0xff]  }
 0x164   : > { %v5086_v8 = vpop.eup %5085  ;;  %v4777_v13 = vld [vmem:[%s6856_s3 + $0x524] ss:$16 sps:$4 sm:$0xff]   ;;  %v4780_v57 = vld [vmem:[%s6856_s3 + $0x52c] ss:$16 sps:$4 sm:$0xff]   ;;  %v4775_v18 = vld [vmem:[%s6856_s3 + $0x520] ss:$16 sps:$4 sm:$0xff]  }
 0x165   : > { %v1208_v14 = vmul.f32 %v5086_v8, %v1176_v33  ;;  %v4778_v33 = vld [vmem:[%s6856_s3 + $0x528] ss:$16 sps:$4 sm:$0xff]   ;;  %v4783_v41 = vld [vmem:[%s6856_s3 + $0x544] ss:$16 sps:$4 sm:$0xff]  }
 0x166   : > { %2848 = vmatpush1.bf16.msra.mxu0 %v4709_v60  ;;  %3020 = vmatpush1.bf16.msra.mxu1 %v4712_v42  ;;  %v4786_v60 = vld [vmem:[%s6856_s3 + $0x54c] ss:$16 sps:$4 sm:$0xff]   ;;  %v4781_v42 = vld [vmem:[%s6856_s3 + $0x540] ss:$16 sps:$4 sm:$0xff]   ;;  %v4784_v63 = vld [vmem:[%s6856_s3 + $0x548] ss:$16 sps:$4 sm:$0xff]  }
 0x167   : > { %v5088_v47 = vpop.eup %5087  ;;  %2849 = vmatprep.subr.bf16.mxu0 %v4717_v7  ;;  %3021 = vmatprep.subr.bf16.mxu1 %v4720_v3  ;;  %v6055_v51 = vpack.c.bf16 %v1208_v14, %v1200_v5  ;;  %v4789_v6 = vld [vmem:[%s6856_s3 + $0x564] ss:$16 sps:$4 sm:$0xff]   ;;  %v4792_v7 = vld [vmem:[%s6856_s3 + $0x56c] ss:$16 sps:$4 sm:$0xff]   ;;  %v4787_v3 = vld [vmem:[%s6856_s3 + $0x560] ss:$16 sps:$4 sm:$0xff]  }
 0x168   : > { %v1209_v44 = vmul.f32 %v5088_v47, %v1177_v39  ;;  %v4790_v5 = vld [vmem:[%s6856_s3 + $0x568] ss:$16 sps:$4 sm:$0xff]   ;;  %v4795_v8 = vld [vmem:[%s6856_s3 + $0x584] ss:$16 sps:$4 sm:$0xff]   ;;  %v4798_v39 = vld [vmem:[%s6856_s3 + $0x58c] ss:$16 sps:$4 sm:$0xff]  }
 0x169   : > { %v4793_v14 = vld [vmem:[%s6856_s3 + $0x580] ss:$16 sps:$4 sm:$0xff]  }
 0x16a   : > { %2850 = vmatpush1.bf16.msra.mxu0 %v4715_v21  ;;  %3022 = vmatpush1.bf16.msra.mxu1 %v4718_v15  ;;  %v6063_v20 = vpack.c.bf16 %v1209_v44, %v1201_v49  ;;  %v4796_v21 = vld [vmem:[%s6856_s3 + $0x588] ss:$16 sps:$4 sm:$0xff]   ;;  %v4801_v15 = vld [vmem:[%s6856_s3 + $0x5a4] ss:$16 sps:$4 sm:$0xff]   ;;  %v4804_v49 = vld [vmem:[%s6856_s3 + $0x5ac] ss:$16 sps:$4 sm:$0xff]  }
 0x16b   : > { %2862 = vmatprep.subr.bf16.mxu0 %v4723_v61  ;;  %3034 = vmatprep.subr.bf16.mxu1 %v4726_v59  ;;  %v4799_v47 = vld [vmem:[%s6856_s3 + $0x5a0] ss:$16 sps:$4 sm:$0xff]   ;;  %v4802_v61 = vld [vmem:[%s6856_s3 + $0x5a8] ss:$16 sps:$4 sm:$0xff]   ;;  %v4807_v59 = vld [vmem:[%s6856_s3 + $0x5c4] ss:$16 sps:$4 sm:$0xff]  }
 0x16c   : > { %v4810_v44 = vld [vmem:[%s6856_s3 + $0x5cc] ss:$16 sps:$4 sm:$0xff]  }
 0x16d   : > { %2852 = vmatmul.mubr.bf16.vlgmr.msra.gmra.mrb[4].mxu0 %v5929_v31  ;;  %3024 = vmatmul.mubr.bf16.vlgmr.msra.gmra.mrb[12].mxu1 %v5929_v31  ;;  %v4738_v31 = vld [vmem:[%s6856_s3 + $0x44c] ss:$16 sps:$4 sm:$0xff]  }
 0x16e   : > { %2863 = vmatpush1.bf16.msra.mxu0 %v4721_v17  ;;  %3035 = vmatpush1.bf16.msra.mxu1 %v4724_v19  ;;  %v4805_v17 = vld [vmem:[%s6856_s3 + $0x5c0] ss:$16 sps:$4 sm:$0xff]   ;;  %v4808_v19 = vld [vmem:[%s6856_s3 + $0x5c8] ss:$16 sps:$4 sm:$0xff]  }
 0x16f   : > { %2864 = vmatprep.subr.bf16.mxu0 %v4729_v35  ;;  %3036 = vmatprep.subr.bf16.mxu1 %v4732_v38  ;;  %v4813_v35 = vld [vmem:[%s6856_s3 + $0x5e4] ss:$16 sps:$4 sm:$0xff]   ;;  %v4816_v38 = vld [vmem:[%s6856_s3 + $0x5ec] ss:$16 sps:$4 sm:$0xff]  }
 0x170   : > { %2894 = vmatprep.mubr.bf16.mxu0 %v5921_v4  ;;  %3066 = vmatprep.mubr.bf16.mxu1 %v5921_v4  ;;  %v4744_v4 = vld [vmem:[%s6856_s3 + $0x46c] ss:$16 sps:$4 sm:$0xff]  }
 0x172   : > { %2865 = vmatpush1.bf16.msra.mxu0 %v4727_v22  ;;  %3037 = vmatpush1.bf16.msra.mxu1 %v4730_v1  ;;  %v4811_v22 = vld [vmem:[%s6856_s3 + $0x5e0] ss:$16 sps:$4 sm:$0xff]   ;;  %v4814_v1 = vld [vmem:[%s6856_s3 + $0x5e8] ss:$16 sps:$4 sm:$0xff]  }
 0x173   : > { %2866 = vmatprep.subr.bf16.mxu0 %v4735_v24  ;;  %3038 = vmatprep.subr.bf16.mxu1 %v4738_v31  ;;  %v4819_v24 = vld [vmem:[%s6856_s3 + $0x604] ss:$16 sps:$4 sm:$0xff]   ;;  %v4822_v31 = vld [vmem:[%s6856_s3 + $0x60c] ss:$16 sps:$4 sm:$0xff]  }
 0x176   : > { %2867 = vmatpush1.bf16.msra.mxu0 %v4733_v26  ;;  %3039 = vmatpush1.bf16.msra.mxu1 %v4736_v16  ;;  %v4817_v26 = vld [vmem:[%s6856_s3 + $0x600] ss:$16 sps:$4 sm:$0xff]   ;;  %v4820_v16 = vld [vmem:[%s6856_s3 + $0x608] ss:$16 sps:$4 sm:$0xff]  }
 0x177   : > { %2868 = vmatprep.subr.bf16.mxu0 %v4741_v28  ;;  %3040 = vmatprep.subr.bf16.mxu1 %v4744_v4  ;;  %v4825_v28 = vld [vmem:[%s6856_s3 + $0x624] ss:$16 sps:$4 sm:$0xff]   ;;  %v4828_v4 = vld [vmem:[%s6856_s3 + $0x62c] ss:$16 sps:$4 sm:$0xff]  }
 0x17a   : > { %2869 = vmatpush1.bf16.msra.mxu0 %v4739_v62  ;;  %3041 = vmatpush1.bf16.msra.mxu1 %v4742_v29  ;;  %v4823_v62 = vld [vmem:[%s6856_s3 + $0x620] ss:$16 sps:$4 sm:$0xff]   ;;  %v4826_v29 = vld [vmem:[%s6856_s3 + $0x628] ss:$16 sps:$4 sm:$0xff]  }
 0x17b   : > { %2870 = vmatprep.subr.bf16.mxu0 %v4747_v0  ;;  %3042 = vmatprep.subr.bf16.mxu1 %v4750_v25  ;;  %v4831_v0 = vld [vmem:[%s6856_s3 + $0x644] ss:$16 sps:$4 sm:$0xff]   ;;  %v4829_v25 = vld [vmem:[%s6856_s3 + $0x640] ss:$16 sps:$4 sm:$0xff]  }
 0x17e   : > { %2871 = vmatpush1.bf16.msra.mxu0 %v4745_v27  ;;  %3043 = vmatpush1.bf16.msra.mxu1 %v4748_v11  ;;  %v4832_v27 = vld [vmem:[%s6856_s3 + $0x648] ss:$16 sps:$4 sm:$0xff]   ;;  %v4837_v11 = vld [vmem:[%s6856_s3 + $0x664] ss:$16 sps:$4 sm:$0xff]  }
 0x17f   : > { %2872 = vmatprep.subr.bf16.mxu0 %v4753_v30  ;;  %3044 = vmatprep.subr.bf16.mxu1 %v4756_v58  ;;  %v4835_v30 = vld [vmem:[%s6856_s3 + $0x660] ss:$16 sps:$4 sm:$0xff]   ;;  %v4838_v58 = vld [vmem:[%s6856_s3 + $0x668] ss:$16 sps:$4 sm:$0xff]  }
 0x182   : > { %2873 = vmatpush1.bf16.msra.mxu0 %v4751_v2  ;;  %3045 = vmatpush1.bf16.msra.mxu1 %v4754_v32  ;;  %v4843_v2 = vld [vmem:[%s6856_s3 + $0x684] ss:$16 sps:$4 sm:$0xff]   ;;  %v4846_v32 = vld [vmem:[%s6856_s3 + $0x68c] ss:$16 sps:$4 sm:$0xff]  }
 0x183   : > { %2874 = vmatprep.subr.bf16.mxu0 %v4759_v23  ;;  %3046 = vmatprep.subr.bf16.mxu1 %v4762_v34  ;;  %v4841_v23 = vld [vmem:[%s6856_s3 + $0x680] ss:$16 sps:$4 sm:$0xff]   ;;  %v4844_v34 = vld [vmem:[%s6856_s3 + $0x688] ss:$16 sps:$4 sm:$0xff]  }
 0x186   : > { %2875 = vmatpush1.bf16.msra.mxu0 %v4757_v40  ;;  %3047 = vmatpush1.bf16.msra.mxu1 %v4760_v43  ;;  %v4849_v40 = vld [vmem:[%s6856_s3 + $0x6a4] ss:$16 sps:$4 sm:$0xff]   ;;  %v4852_v43 = vld [vmem:[%s6856_s3 + $0x6ac] ss:$16 sps:$4 sm:$0xff]  }
 0x187   : > { %2876 = vmatprep.subr.bf16.mxu0 %v4765_v45  ;;  %3048 = vmatprep.subr.bf16.mxu1 %v4768_v46  ;;  %v4847_v45 = vld [vmem:[%s6856_s3 + $0x6a0] ss:$16 sps:$4 sm:$0xff]   ;;  %v4850_v46 = vld [vmem:[%s6856_s3 + $0x6a8] ss:$16 sps:$4 sm:$0xff]  }
 0x18a   : > { %2877 = vmatpush1.bf16.msra.mxu0 %v4763_v36  ;;  %3049 = vmatpush1.bf16.msra.mxu1 %v4766_v48  ;;  %v4855_v36 = vld [vmem:[%s6856_s3 + $0x6c4] ss:$16 sps:$4 sm:$0xff]   ;;  %v4858_v48 = vld [vmem:[%s6856_s3 + $0x6cc] ss:$16 sps:$4 sm:$0xff]  }
 0x18b   : > { %2878 = vmatprep.subr.bf16.mxu0 %v4771_v50  ;;  %3050 = vmatprep.subr.bf16.mxu1 %v4774_v52  ;;  %v4853_v50 = vld [vmem:[%s6856_s3 + $0x6c0] ss:$16 sps:$4 sm:$0xff]   ;;  %v4856_v52 = vld [vmem:[%s6856_s3 + $0x6c8] ss:$16 sps:$4 sm:$0xff]  }
 0x18e   : > { %2879 = vmatpush1.bf16.msra.mxu0 %v4769_v56  ;;  %3051 = vmatpush1.bf16.msra.mxu1 %v4772_v53  ;;  %v4861_v56 = vld [vmem:[%s6856_s3 + $0x6e4] ss:$16 sps:$4 sm:$0xff]   ;;  %v4864_v53 = vld [vmem:[%s6856_s3 + $0x6ec] ss:$16 sps:$4 sm:$0xff]  }
 0x18f   : > { %2880 = vmatprep.subr.bf16.mxu0 %v4777_v13  ;;  %3052 = vmatprep.subr.bf16.mxu1 %v4780_v57  ;;  %v4859_v13 = vld [vmem:[%s6856_s3 + $0x6e0] ss:$16 sps:$4 sm:$0xff]   ;;  %v4862_v57 = vld [vmem:[%s6856_s3 + $0x6e8] ss:$16 sps:$4 sm:$0xff]  }
 0x192   : > { %2881 = vmatpush1.bf16.msra.mxu0 %v4775_v18  ;;  %3053 = vmatpush1.bf16.msra.mxu1 %v4778_v33  ;;  %v4867_v18 = vld [vmem:[%s6856_s3 + $0x704] ss:$16 sps:$4 sm:$0xff]   ;;  %v4870_v33 = vld [vmem:[%s6856_s3 + $0x70c] ss:$16 sps:$4 sm:$0xff]  }
 0x193   : > { %2882 = vmatprep.subr.bf16.mxu0 %v4783_v41  ;;  %3054 = vmatprep.subr.bf16.mxu1 %v4786_v60  ;;  %v4865_v41 = vld [vmem:[%s6856_s3 + $0x700] ss:$16 sps:$4 sm:$0xff]   ;;  %v4868_v60 = vld [vmem:[%s6856_s3 + $0x708] ss:$16 sps:$4 sm:$0xff]  }
 0x196   : > { %2883 = vmatpush1.bf16.msra.mxu0 %v4781_v42  ;;  %3055 = vmatpush1.bf16.msra.mxu1 %v4784_v63  ;;  %v4873_v42 = vld [vmem:[%s6856_s3 + $0x724] ss:$16 sps:$4 sm:$0xff]   ;;  %v4876_v63 = vld [vmem:[%s6856_s3 + $0x72c] ss:$16 sps:$4 sm:$0xff]  }
 0x197   : > { %2884 = vmatprep.subr.bf16.mxu0 %v4789_v6  ;;  %3056 = vmatprep.subr.bf16.mxu1 %v4792_v7  ;;  %v4871_v6 = vld [vmem:[%s6856_s3 + $0x720] ss:$16 sps:$4 sm:$0xff]   ;;  %v4874_v7 = vld [vmem:[%s6856_s3 + $0x728] ss:$16 sps:$4 sm:$0xff]  }
 0x19a   : > { %2885 = vmatpush1.bf16.msra.mxu0 %v4787_v3  ;;  %3057 = vmatpush1.bf16.msra.mxu1 %v4790_v5  ;;  %v4879_v3 = vld [vmem:[%s6856_s3 + $0x744] ss:$16 sps:$4 sm:$0xff]   ;;  %v4882_v5 = vld [vmem:[%s6856_s3 + $0x74c] ss:$16 sps:$4 sm:$0xff]  }
 0x19b   : > { %2886 = vmatprep.subr.bf16.mxu0 %v4795_v8  ;;  %3058 = vmatprep.subr.bf16.mxu1 %v4798_v39  ;;  %v4877_v8 = vld [vmem:[%s6856_s3 + $0x740] ss:$16 sps:$4 sm:$0xff]   ;;  %v4880_v39 = vld [vmem:[%s6856_s3 + $0x748] ss:$16 sps:$4 sm:$0xff]  }
 0x19e   : > { %2887 = vmatpush1.bf16.msra.mxu0 %v4793_v14  ;;  %3059 = vmatpush1.bf16.msra.mxu1 %v4796_v21  ;;  %v4885_v14 = vld [vmem:[%s6856_s3 + $0x764] ss:$16 sps:$4 sm:$0xff]   ;;  %v4888_v21 = vld [vmem:[%s6856_s3 + $0x76c] ss:$16 sps:$4 sm:$0xff]  }
 0x19f   : > { %2888 = vmatprep.subr.bf16.mxu0 %v4801_v15  ;;  %3060 = vmatprep.subr.bf16.mxu1 %v4804_v49  ;;  %v4883_v15 = vld [vmem:[%s6856_s3 + $0x760] ss:$16 sps:$4 sm:$0xff]   ;;  %v4886_v49 = vld [vmem:[%s6856_s3 + $0x768] ss:$16 sps:$4 sm:$0xff]  }
 0x1a2   : > { %2889 = vmatpush1.bf16.msra.mxu0 %v4799_v47  ;;  %3061 = vmatpush1.bf16.msra.mxu1 %v4802_v61  ;;  %v4891_v47 = vld [vmem:[%s6856_s3 + $0x784] ss:$16 sps:$4 sm:$0xff]   ;;  %v4894_v61 = vld [vmem:[%s6856_s3 + $0x78c] ss:$16 sps:$4 sm:$0xff]  }
 0x1a3   : > { %2890 = vmatprep.subr.bf16.mxu0 %v4807_v59  ;;  %3062 = vmatprep.subr.bf16.mxu1 %v4810_v44  ;;  %v4889_v59 = vld [vmem:[%s6856_s3 + $0x780] ss:$16 sps:$4 sm:$0xff]   ;;  %v4892_v44 = vld [vmem:[%s6856_s3 + $0x788] ss:$16 sps:$4 sm:$0xff]  }
 0x1a6   : > { %2891 = vmatpush1.bf16.msra.mxu0 %v4805_v17  ;;  %3063 = vmatpush1.bf16.msra.mxu1 %v4808_v19  ;;  %v4897_v17 = vld [vmem:[%s6856_s3 + $0x7a4] ss:$16 sps:$4 sm:$0xff]   ;;  %v4900_v19 = vld [vmem:[%s6856_s3 + $0x7ac] ss:$16 sps:$4 sm:$0xff]  }
 0x1a7   : > { %2892 = vmatprep.subr.bf16.mxu0 %v4813_v35  ;;  %3064 = vmatprep.subr.bf16.mxu1 %v4816_v38  ;;  %v4895_v35 = vld [vmem:[%s6856_s3 + $0x7a0] ss:$16 sps:$4 sm:$0xff]   ;;  %v4898_v38 = vld [vmem:[%s6856_s3 + $0x7a8] ss:$16 sps:$4 sm:$0xff]  }
 0x1aa   : > { %2893 = vmatpush1.bf16.msra.mxu0 %v4811_v22  ;;  %3065 = vmatpush1.bf16.msra.mxu1 %v4814_v1  ;;  %v4903_v22 = vld [vmem:[%s6856_s3 + $0x7c4] ss:$16 sps:$4 sm:$0xff]   ;;  %v4906_v1 = vld [vmem:[%s6856_s3 + $0x7cc] ss:$16 sps:$4 sm:$0xff]  }
 0x1ab   : > { %2905 = vmatprep.subr.bf16.mxu0 %v4819_v24  ;;  %3077 = vmatprep.subr.bf16.mxu1 %v4822_v31  ;;  %v4901_v24 = vld [vmem:[%s6856_s3 + $0x7c0] ss:$16 sps:$4 sm:$0xff]   ;;  %v4904_v31 = vld [vmem:[%s6856_s3 + $0x7c8] ss:$16 sps:$4 sm:$0xff]  }
 0x1ad   : > { %2895 = vmatmul.mubr.bf16.vlgmr.msra.gmra.mrb[4].mxu0 %v5849_v37  ;;  %3067 = vmatmul.mubr.bf16.vlgmr.msra.gmra.mrb[12].mxu1 %v5849_v37  ;;  %v4834_v37 = vld [vmem:[%s6856_s3 + $0x64c] ss:$16 sps:$4 sm:$0xff]  }
 0x1ae   : > { %2906 = vmatpush1.bf16.msra.mxu0 %v4817_v26  ;;  %3078 = vmatpush1.bf16.msra.mxu1 %v4820_v16  ;;  %v4909_v26 = vld [vmem:[%s6856_s3 + $0x7e4] ss:$16 sps:$4 sm:$0xff]   ;;  %v4912_v16 = vld [vmem:[%s6856_s3 + $0x7ec] ss:$16 sps:$4 sm:$0xff]  }
 0x1af   : > { %2907 = vmatprep.subr.bf16.mxu0 %v4825_v28  ;;  %3079 = vmatprep.subr.bf16.mxu1 %v4828_v4  ;;  %v4907_v28 = vld [vmem:[%s6856_s3 + $0x7e0] ss:$16 sps:$4 sm:$0xff]   ;;  %v4910_v4 = vld [vmem:[%s6856_s3 + $0x7e8] ss:$16 sps:$4 sm:$0xff]  }
 0x1b0   : > { %2937 = vmatprep.mubr.bf16.mxu0 %v6063_v20  ;;  %3109 = vmatprep.mubr.bf16.mxu1 %v6063_v20  ;;  %v4840_v20 = vld [vmem:[%s6856_s3 + $0x66c] ss:$16 sps:$4 sm:$0xff]  }
 0x1b2   : > { %2908 = vmatpush1.bf16.msra.mxu0 %v4823_v62  ;;  %3080 = vmatpush1.bf16.msra.mxu1 %v4826_v29  ;;  %v4915_v62 = vld [vmem:[%s6858_s5 + $0x4] ss:$8 sps:$4 sm:$0xff]   ;;  %v4913_v29 = vld [vmem:[%s6858_s5] ss:$8 sps:$4 sm:$0xff]  }
 0x1b3   : > { %2909 = vmatprep.subr.bf16.mxu0 %v4831_v0  ;;  %3081 = vmatprep.subr.bf16.mxu1 %v4834_v37  ;;  %v4918_v0 = vld [vmem:[%s6858_s5 + $0x14] ss:$8 sps:$4 sm:$0xff]   ;;  %v4916_v37 = vld [vmem:[%s6858_s5 + $0x10] ss:$8 sps:$4 sm:$0xff]  }
 0x1b6   : > { %2910 = vmatpush1.bf16.msra.mxu0 %v4829_v25  ;;  %3082 = vmatpush1.bf16.msra.mxu1 %v4832_v27  ;;  %v4921_v25 = vld [vmem:[%s6858_s5 + $0x24] ss:$8 sps:$4 sm:$0xff]   ;;  %v4919_v27 = vld [vmem:[%s6858_s5 + $0x20] ss:$8 sps:$4 sm:$0xff]  }
 0x1b7   : > { %2911 = vmatprep.subr.bf16.mxu0 %v4837_v11  ;;  %3083 = vmatprep.subr.bf16.mxu1 %v4840_v20  ;;  %v4922_v11 = vld [vmem:[%s6858_s5 + $0x30] ss:$8 sps:$4 sm:$0xff]   ;;  %v4927_v20 = vld [vmem:[%s6858_s5 + $0x44] ss:$8 sps:$4 sm:$0xff]  }
 0x1ba   : > { %2912 = vmatpush1.bf16.msra.mxu0 %v4835_v30  ;;  %3084 = vmatpush1.bf16.msra.mxu1 %v4838_v58  ;;  %v4925_v30 = vld [vmem:[%s6858_s5 + $0x40] ss:$8 sps:$4 sm:$0xff]   ;;  %v4930_v58 = vld [vmem:[%s6858_s5 + $0x54] ss:$8 sps:$4 sm:$0xff]  }
 0x1bb   : > { %2913 = vmatprep.subr.bf16.mxu0 %v4843_v2  ;;  %3085 = vmatprep.subr.bf16.mxu1 %v4846_v32  ;;  %v4928_v2 = vld [vmem:[%s6858_s5 + $0x50] ss:$8 sps:$4 sm:$0xff]   ;;  %v4933_v32 = vld [vmem:[%s6858_s5 + $0x64] ss:$8 sps:$4 sm:$0xff]  }
 0x1be   : > { %2914 = vmatpush1.bf16.msra.mxu0 %v4841_v23  ;;  %3086 = vmatpush1.bf16.msra.mxu1 %v4844_v34  ;;  %v4931_v23 = vld [vmem:[%s6858_s5 + $0x60] ss:$8 sps:$4 sm:$0xff]   ;;  %v4936_v34 = vld [vmem:[%s6858_s5 + $0x74] ss:$8 sps:$4 sm:$0xff]  }
 0x1bf   : > { %2915 = vmatprep.subr.bf16.mxu0 %v4849_v40  ;;  %3087 = vmatprep.subr.bf16.mxu1 %v4852_v43  ;;  %v4934_v40 = vld [vmem:[%s6858_s5 + $0x70] ss:$8 sps:$4 sm:$0xff]   ;;  %v4939_v43 = vld [vmem:[%s6858_s5 + $0x84] ss:$8 sps:$4 sm:$0xff]  }
 0x1c2   : > { %2916 = vmatpush1.bf16.msra.mxu0 %v4847_v45  ;;  %3088 = vmatpush1.bf16.msra.mxu1 %v4850_v46  ;;  %v4937_v45 = vld [vmem:[%s6858_s5 + $0x80] ss:$8 sps:$4 sm:$0xff]   ;;  %v4942_v46 = vld [vmem:[%s6858_s5 + $0x94] ss:$8 sps:$4 sm:$0xff]  }
 0x1c3   : > { %2917 = vmatprep.subr.bf16.mxu0 %v4855_v36  ;;  %3089 = vmatprep.subr.bf16.mxu1 %v4858_v48  ;;  %v4940_v36 = vld [vmem:[%s6858_s5 + $0x90] ss:$8 sps:$4 sm:$0xff]   ;;  %v4945_v48 = vld [vmem:[%s6858_s5 + $0xa4] ss:$8 sps:$4 sm:$0xff]  }
 0x1c6   : > { %2918 = vmatpush1.bf16.msra.mxu0 %v4853_v50  ;;  %3090 = vmatpush1.bf16.msra.mxu1 %v4856_v52  ;;  %v4943_v50 = vld [vmem:[%s6858_s5 + $0xa0] ss:$8 sps:$4 sm:$0xff]   ;;  %v4948_v52 = vld [vmem:[%s6858_s5 + $0xb4] ss:$8 sps:$4 sm:$0xff]  }
 0x1c7   : > { %2919 = vmatprep.subr.bf16.mxu0 %v4861_v56  ;;  %3091 = vmatprep.subr.bf16.mxu1 %v4864_v53  ;;  %v4946_v56 = vld [vmem:[%s6858_s5 + $0xb0] ss:$8 sps:$4 sm:$0xff]   ;;  %v4951_v53 = vld [vmem:[%s6858_s5 + $0xc4] ss:$8 sps:$4 sm:$0xff]  }
 0x1ca   : > { %2920 = vmatpush1.bf16.msra.mxu0 %v4859_v13  ;;  %3092 = vmatpush1.bf16.msra.mxu1 %v4862_v57  ;;  %v4949_v13 = vld [vmem:[%s6858_s5 + $0xc0] ss:$8 sps:$4 sm:$0xff]   ;;  %v4954_v57 = vld [vmem:[%s6858_s5 + $0xd4] ss:$8 sps:$4 sm:$0xff]  }
 0x1cb   : > { %2921 = vmatprep.subr.bf16.mxu0 %v4867_v18  ;;  %3093 = vmatprep.subr.bf16.mxu1 %v4870_v33  ;;  %v4952_v18 = vld [vmem:[%s6858_s5 + $0xd0] ss:$8 sps:$4 sm:$0xff]   ;;  %v4955_v33 = vld [vmem:[%s6858_s5 + $0xe0] ss:$8 sps:$4 sm:$0xff]  }
 0x1ce   : > { %2922 = vmatpush1.bf16.msra.mxu0 %v4865_v41  ;;  %3094 = vmatpush1.bf16.msra.mxu1 %v4868_v60  ;;  %v4957_v41 = vld [vmem:[%s6858_s5 + $0xe4] ss:$8 sps:$4 sm:$0xff]   ;;  %v4960_v60 = vld [vmem:[%s6858_s5 + $0xf4] ss:$8 sps:$4 sm:$0xff]  }
 0x1cf   : > { %2923 = vmatprep.subr.bf16.mxu0 %v4873_v42  ;;  %3095 = vmatprep.subr.bf16.mxu1 %v4876_v63  ;;  %v4958_v42 = vld [vmem:[%s6858_s5 + $0xf0] ss:$8 sps:$4 sm:$0xff]   ;;  %v4963_v63 = vld [vmem:[%s6858_s5 + $0x104] ss:$8 sps:$4 sm:$0xff]  }
 0x1d2   : > { %2924 = vmatpush1.bf16.msra.mxu0 %v4871_v6  ;;  %3096 = vmatpush1.bf16.msra.mxu1 %v4874_v7  ;;  %v1474_v6 = vld [vmem:[%s6857_s4] sm:$0xf] }
 0x1d3   : > { %2925 = vmatprep.subr.bf16.mxu0 %v4879_v3  ;;  %3097 = vmatprep.subr.bf16.mxu1 %v4882_v5  ;;  %v1479_v7 = vrot.slane %v1474_v6, %v5623_v10  ;;  %v1487_v3 = vrot.slane %v1474_v6, %v416_v54  ;;  %v1483_v5 = vrot.slane %v1474_v6, %v5631_v12 }
 0x1d6   : > { %2926 = vmatpush1.bf16.msra.mxu0 %v4877_v8  ;;  %3098 = vmatpush1.bf16.msra.mxu1 %v4880_v39  ;;  %v1491_v8 = vrot.slane %v1474_v6, %v420_v55 }
 0x1d7   : > { %2927 = vmatprep.subr.bf16.mxu0 %v4885_v14  ;;  %3099 = vmatprep.subr.bf16.mxu1 %v4888_v21 }
 0x1da   : > { %2928 = vmatpush1.bf16.msra.mxu0 %v4883_v15  ;;  %3100 = vmatpush1.bf16.msra.mxu1 %v4886_v49 }
 0x1db   : > { %2929 = vmatprep.subr.bf16.mxu0 %v4891_v47  ;;  %3101 = vmatprep.subr.bf16.mxu1 %v4894_v61 }
 0x1de   : > { %2930 = vmatpush1.bf16.msra.mxu0 %v4889_v59  ;;  %3102 = vmatpush1.bf16.msra.mxu1 %v4892_v44 }
 0x1df   : > { %2931 = vmatprep.subr.bf16.mxu0 %v4897_v17  ;;  %3103 = vmatprep.subr.bf16.mxu1 %v4900_v19 }
 0x1e2   : > { %2932 = vmatpush1.bf16.msra.mxu0 %v4895_v35  ;;  %3104 = vmatpush1.bf16.msra.mxu1 %v4898_v38 }
 0x1e3   : > { %2933 = vmatprep.subr.bf16.mxu0 %v4903_v22  ;;  %3105 = vmatprep.subr.bf16.mxu1 %v4906_v1 }
 0x1e6   : > { %2934 = vmatpush1.bf16.msra.mxu0 %v4901_v24  ;;  %3106 = vmatpush1.bf16.msra.mxu1 %v4904_v31 }
 0x1e7   : > { %2935 = vmatprep.subr.bf16.mxu0 %v4909_v26  ;;  %3107 = vmatprep.subr.bf16.mxu1 %v4912_v16 }
 0x1ea   : > { %2936 = vmatpush1.bf16.msra.mxu0 %v4907_v28  ;;  %3108 = vmatpush1.bf16.msra.mxu1 %v4910_v4 }
 0x1eb   : > { %3656 = vmatprep.subr.bf16.mxu0 %v4915_v62 }
 0x1ed   : > { %2938 = vmatmul.mubr.bf16.vlgmr.msra.gmra.mrb[4].mxu0 %v6055_v51  ;;  %3110 = vmatmul.mubr.bf16.vlgmr.msra.gmra.mrb[12].mxu1 %v6055_v51  ;;  %v4924_v51 = vld [vmem:[%s6858_s5 + $0x34] ss:$8 sps:$4 sm:$0xff]  }
 0x1ee   : > { %3657 = vmatpush1.bf16.msra.mxu0 %v4913_v29 }
 0x1ef   : > { %3658 = vmatprep.subr.bf16.mxu0 %v4918_v0 }
 0x1f2   : > { %3659 = vmatpush1.bf16.msra.mxu0 %v4916_v37 }
 0x1f3   : > { %3660 = vmatprep.subr.bf16.mxu0 %v4921_v25 }
 0x1f6   : > { %3661 = vmatpush1.bf16.msra.mxu0 %v4919_v27 }
 0x1f7   : > { %3662 = vmatprep.subr.bf16.mxu0 %v4924_v51 }
 0x1fa   : > { %3663 = vmatpush1.bf16.msra.mxu0 %v4922_v11 }
 0x1fb   : > { %3664 = vmatprep.subr.bf16.mxu0 %v4927_v20 }
 0x1fe   : > { %3665 = vmatpush1.bf16.msra.mxu0 %v4925_v30 }
 0x1ff   : > { %3666 = vmatprep.subr.bf16.mxu0 %v4930_v58 }
 0x202   : > { %3667 = vmatpush1.bf16.msra.mxu0 %v4928_v2 }
 0x203   : > { %3668 = vmatprep.subr.bf16.mxu0 %v4933_v32 }
 0x206   : > { %3669 = vmatpush1.bf16.msra.mxu0 %v4931_v23 }
 0x207   : > { %3670 = vmatprep.subr.bf16.mxu0 %v4936_v34 }
 0x20a   : > { %3671 = vmatpush1.bf16.msra.mxu0 %v4934_v40 }
 0x20b   : > { %3672 = vmatprep.subr.bf16.mxu0 %v4939_v43 }
 0x20e   : > { %3673 = vmatpush1.bf16.msra.mxu0 %v4937_v45 }
 0x20f   : > { %3674 = vmatprep.subr.bf16.mxu0 %v4942_v46 }
 0x212   : > { %3675 = vmatpush1.bf16.msra.mxu0 %v4940_v36 }
 0x213   : > { %3676 = vmatprep.subr.bf16.mxu0 %v4945_v48 }
 0x216   : > { %3677 = vmatpush1.bf16.msra.mxu0 %v4943_v50 }
 0x217   : > { %3678 = vmatprep.subr.bf16.mxu0 %v4948_v52 }
 0x21a   : > { %3679 = vmatpush1.bf16.msra.mxu0 %v4946_v56 }
 0x21b   : > { %3680 = vmatprep.subr.bf16.mxu0 %v4951_v53 }
 0x21e   : > { %3681 = vmatpush1.bf16.msra.mxu0 %v4949_v13 }
 0x21f   : > { %3682 = vmatprep.subr.bf16.mxu0 %v4954_v57 }
 0x222   : > { %3683 = vmatpush1.bf16.msra.mxu0 %v4952_v18 }
 0x223   : > { %3684 = vmatprep.subr.bf16.mxu0 %v4957_v41 }
 0x226   : > { %3685 = vmatpush1.bf16.msra.mxu0 %v4955_v33 }
 0x227   : > { %3686 = vmatprep.subr.bf16.mxu0 %v4960_v60 }
 0x22a   : > { %3687 = vmatpush1.bf16.msra.mxu0 %v4958_v42 }
 0x22b   : > { %3699 = vmatprep.subr.bf16.mxu0 %v4963_v63 }
 0x2c0   : > { %v2939_v39 = vpop.f32.mrb[4].mxu0  ;;  %v3111_v14 = vpop.f32.mrb[12].mxu1 }
 0x2c1   : > { %v6555_v21 = vadd.f32 %v2939_v39, %v1479_v7  ;;  %v6557_v15 = vadd.f32 %v3111_v14, %v1487_v3  ;;  %v2941_v49 = vpop.f32.mrb[5].mxu0  ;;  %v3113_v47 = vpop.f32.mrb[13].mxu1 }
 0x2c2   : > { %v6559_v61 = vadd.f32 %v2941_v49, %v1483_v5  ;;  %v6561_v59 = vadd.f32 %v3113_v47, %v1491_v8  ;;  %v2943_v44 = vpop.f32.mrb[6].mxu0  ;;  %v3115_v17 = vpop.f32.mrb[14].mxu1 }
 0x2c3   : > { %v3120_v54 = vand.u32 2147483647, %v6555_v21  ;;  %v3122_v19 = vand.u32 2147483647, %v6557_v15  ;;  %v6567_v22 = vadd.f32 %v2943_v44, %v1479_v7  ;;  %v6569_v1 = vadd.f32 %v3115_v17, %v1487_v3  ;;  %v2945_v24 = vpop.f32.mrb[7].mxu0  ;;  %v3117_v31 = vpop.f32.mrb[15].mxu1 }
 0x2c4   : > { %v3121_v9 = vand.u32 2147483647, %v6559_v61  ;;  %v3123_v55 = vand.u32 2147483647, %v6561_v59  ;;  %v6571_v28 = vadd.f32 %v2945_v24, %v1483_v5  ;;  %v6574_v0 = vadd.f32 %v3117_v31, %v1491_v8 }
 0x2c5   : > { %v3128_v35 = vsub.f32 0.0, %v3120_v54  ;;  %v3130_v38 = vsub.f32 0.0, %v3122_v19  ;;  %v3124_v29 = vand.u32 2147483647, %v6567_v22  ;;  %v3126_v27 = vand.u32 2147483647, %v6569_v1 }
 0x2c6   : > { %v3129_v26 = vsub.f32 0.0, %v3121_v9  ;;  %v3131_v16 = vsub.f32 0.0, %v3123_v55  ;;  %v3125_v11 = vand.u32 2147483647, %v6571_v28  ;;  %v3127_v30 = vand.u32 2147483647, %v6574_v0 }
 0x2c7   : > { %v3136_v4 = vmul.f32 1.442695, %v3128_v35  ;;  %v3140_v62 = vmul.f32 1.442695, %v3130_v38  ;;  %v3132_v25 = vsub.f32 0.0, %v3124_v29  ;;  %v3134_v20 = vsub.f32 0.0, %v3126_v27 }
 0x2c8   : > { %v3138_v37 = vmul.f32 1.442695, %v3129_v26  ;;  %v3142_v51 = vmul.f32 1.442695, %v3131_v16  ;;  %v3133_v32 = vsub.f32 0.0, %v3125_v11  ;;  %v3135_v23 = vsub.f32 0.0, %v3127_v30 }
 0x2c9   : > { %5089 = vpow2.f32 %v3136_v4  ;;  %v3144_v58 = vmul.f32 1.442695, %v3132_v25  ;;  %v3148_v2 = vmul.f32 1.442695, %v3134_v20  ;;  %vm3208_vm0 = vcmp.ge.f32.partialorder %v6555_v21, 0.0 }
 0x2ca   : > { %5091 = vpow2.f32 %v3140_v62  ;;  %v3146_v34 = vmul.f32 1.442695, %v3133_v32  ;;  %v3150_v43 = vmul.f32 1.442695, %v3135_v23  ;;  %vm3210_vm1 = vcmp.ge.f32.partialorder %v6557_v15, 0.0 }
 0x2cb   : > { %5093 = vpow2.f32 %v3138_v37  ;;  %vm3212_vm2 = vcmp.ge.f32.partialorder %v6567_v22, 0.0  ;;  %vm3209_vm3 = vcmp.ge.f32.partialorder %v6559_v61, 0.0  ;;  %vm3214_vm4 = vcmp.ge.f32.partialorder %v6569_v1, 0.0 }
 0x2cc   : > { %5095 = vpow2.f32 %v3142_v51  ;;  %vm3211_vm5 = vcmp.ge.f32.partialorder %v6561_v59, 0.0  ;;  %vm3213_vm6 = vcmp.ge.f32.partialorder %v6571_v28, 0.0  ;;  %vm3215_vm7 = vcmp.ge.f32.partialorder %v6574_v0, 0.0 }
 0x2cd   : > { %5097 = vpow2.f32 %v3144_v58 }
 0x2ce   : > { %5099 = vpow2.f32 %v3148_v2 }
 0x2cf   : > { %5101 = vpow2.f32 %v3146_v34 }
 0x2d0   : > { %5103 = vpow2.f32 %v3150_v43 }
 0x2d3   : > { %v5090_v40 = vpop.eup %5089 }
 0x2d4   : > { %v5092_v45 = vpop.eup %5091  ;;  %v3152_v46 = vmul.f32 2.0, %v5090_v40  ;;  %v3184_v36 = vadd.f32 2.0, %v5090_v40 }
 0x2d5   : > { %v3154_v48 = vmul.f32 2.0, %v5092_v45  ;;  %v3186_v50 = vadd.f32 2.0, %v5092_v45  ;;  %v5094_v52 = vpop.eup %5093 }
 0x2d6   : > { %v6579_v56 = vadd.f32 1.0, %v3152_v46  ;;  %v3168_v53 = vmul.f32 %v5090_v40, %v3152_v46  ;;  %v6581_v13 = vmul.f32 %v5090_v40, %v3184_v36  ;;  %v5096_v57 = vpop.eup %5095  ;;  %v3153_v63 = vmul.f32 2.0, %v5094_v52 }
 0x2d7   : > { %v6585_v41 = vadd.f32 1.0, %v3154_v48  ;;  %v3170_v60 = vmul.f32 %v5092_v45, %v3154_v48  ;;  %v6587_v42 = vmul.f32 %v5092_v45, %v3186_v50  ;;  %v5098_v6 = vpop.eup %5097  ;;  %v3185_v7 = vadd.f32 2.0, %v5094_v52 }
 0x2d8   : > { %v3176_v18 = vadd.f32 %v3168_v53, %v6579_v56  ;;  %v3200_v33 = vadd.f32 2.0, %v6581_v13  ;;  %v5100_v3 = vpop.eup %5099  ;;  %v3155_v5 = vmul.f32 2.0, %v5096_v57  ;;  %v3187_v39 = vadd.f32 2.0, %v5096_v57 }
 0x2d9   : > { %v3178_v14 = vadd.f32 %v3170_v60, %v6585_v41  ;;  %v3202_v49 = vadd.f32 2.0, %v6587_v42  ;;  %v6596_v47 = vadd.f32 1.0, %v3153_v63  ;;  %v3169_v44 = vmul.f32 %v5094_v52, %v3153_v63  ;;  %v5102_v38 = vpop.eup %5101 }
 0x2da   : > { %v3224_v8 = vsel %vm3208_vm0, %v3176_v18, %v3200_v33  ;;  %v6599_v17 = vmul.f32 %v5094_v52, %v3185_v7  ;;  %v3156_v54 = vmul.f32 2.0, %v5098_v6  ;;  %v3188_v19 = vadd.f32 2.0, %v5098_v6  ;;  %v5104_v4 = vpop.eup %5103 }
 0x2db   : > { %v3158_v9 = vmul.f32 2.0, %v5100_v3  ;;  %5105 = vrcp.f32 %v3224_v8  ;;  %v6601_v55 = vadd.f32 1.0, %v3155_v5  ;;  %v3171_v35 = vmul.f32 %v5096_v57, %v3155_v5 }
 0x2dc   : > { %v6604_v24 = vmul.f32 %v5096_v57, %v3187_v39  ;;  %v3164_v31 = vadd.f32 1.0, %v3156_v54  ;;  %v3172_v26 = vmul.f32 %v5098_v6, %v3156_v54  ;;  %v3196_v16 = vmul.f32 %v5098_v6, %v3188_v19 }
 0x2dd   : > { %v3226_v62 = vsel %vm3210_vm1, %v3178_v14, %v3202_v49  ;;  %v3166_v29 = vadd.f32 1.0, %v3158_v9  ;;  %v3174_v37 = vmul.f32 %v5100_v3, %v3158_v9  ;;  %v3190_v25 = vadd.f32 2.0, %v5100_v3 }
 0x2de   : > { %v3177_v27 = vadd.f32 %v3169_v44, %v6596_v47  ;;  %v3201_v51 = vadd.f32 2.0, %v6599_v17  ;;  %v3180_v11 = vadd.f32 %v3172_v26, %v3164_v31  ;;  %v3204_v20 = vadd.f32 2.0, %v3196_v16 }
 0x2df   : > { %v3179_v30 = vadd.f32 %v3171_v35, %v6601_v55  ;;  %v3182_v58 = vadd.f32 %v3174_v37, %v3166_v29  ;;  %v3198_v2 = vmul.f32 %v5100_v3, %v3190_v25  ;;  %v3157_v32 = vmul.f32 2.0, %v5102_v38 }
 0x2e0   : > { %v3203_v23 = vadd.f32 2.0, %v6604_v24  ;;  %v3228_v34 = vsel %vm3212_vm2, %v3180_v11, %v3204_v20  ;;  %v3189_v40 = vadd.f32 2.0, %v5102_v38  ;;  %v3159_v43 = vmul.f32 2.0, %v5104_v4 }
 0x2e1   : > { %5107 = vrcp.f32 %v3228_v34  ;;  %v3206_v45 = vadd.f32 2.0, %v3198_v2  ;;  %v3165_v46 = vadd.f32 1.0, %v3157_v32  ;;  %v3191_v36 = vadd.f32 2.0, %v5104_v4  ;;  %v4970_v34 = vld [vmem:[%s6858_s5 + $0x130] ss:$8 sps:$4 sm:$0xff]  }
 0x2e2   : > { %5109 = vrcp.f32 %v3226_v62  ;;  %v3225_v48 = vsel %vm3209_vm3, %v3177_v27, %v3201_v51  ;;  %v3173_v50 = vmul.f32 %v5102_v38, %v3157_v32  ;;  %v3197_v52 = vmul.f32 %v5102_v38, %v3189_v40  ;;  %v4967_v32 = vld [vmem:[%s6858_s5 + $0x120] ss:$8 sps:$4 sm:$0xff]   ;;  %v4975_v40 = vld [vmem:[%s6858_s5 + $0x144] ss:$8 sps:$4 sm:$0xff]  }
 0x2e3   : > { %v3230_v53 = vsel %vm3214_vm4, %v3182_v58, %v3206_v45  ;;  %v3167_v57 = vadd.f32 1.0, %v3159_v43  ;;  %v3175_v18 = vmul.f32 %v5104_v4, %v3159_v43  ;;  %v3227_v6 = vsel %vm3211_vm5, %v3179_v30, %v3203_v23  ;;  %v4966_v58 = vld [vmem:[%s6858_s5 + $0x114] ss:$8 sps:$4 sm:$0xff]   ;;  %v4973_v43 = vld [vmem:[%s6858_s5 + $0x140] ss:$8 sps:$4 sm:$0xff]  }
 0x2e4   : > { %5111 = vrcp.f32 %v3230_v53  ;;  %v3181_v33 = vadd.f32 %v3173_v50, %v3165_v46  ;;  %v3205_v60 = vadd.f32 2.0, %v3197_v52  ;;  %v3199_v3 = vmul.f32 %v5104_v4, %v3191_v36  ;;  %v4972_v23 = vld [vmem:[%s6858_s5 + $0x134] ss:$8 sps:$4 sm:$0xff]   ;;  %v4981_v36 = vld [vmem:[%s6858_s5 + $0x164] ss:$8 sps:$4 sm:$0xff]  }
 0x2e5   : > { %v5106_v63 = vpop.eup %5105  ;;  %5113 = vrcp.f32 %v3225_v48  ;;  %v3183_v7 = vadd.f32 %v3175_v18, %v3167_v57  ;;  %v3216_v5 = vsel %vm3208_vm0, %v6579_v56, %v6581_v13  ;;  %v3220_v39 = vsel %vm3212_vm2, %v3164_v31, %v3196_v16  ;;  %v4978_v45 = vld [vmem:[%s6858_s5 + $0x154] ss:$8 sps:$4 sm:$0xff]   ;;  %v4979_v48 = vld [vmem:[%s6858_s5 + $0x160] ss:$8 sps:$4 sm:$0xff]   ;;  %v4987_v53 = vld [vmem:[%s6858_s5 + $0x184] ss:$8 sps:$4 sm:$0xff]  }
 0x2e6   : > { %v3229_v8 = vsel %vm3213_vm6, %v3181_v33, %v3205_v60  ;;  %v3207_v14 = vadd.f32 2.0, %v3199_v3  ;;  %v3232_v49 = vmul.f32 %v6555_v21, %v3216_v5  ;;  %v3218_v56 = vsel %vm3210_vm1, %v6585_v41, %v6587_v42  ;;  %v4984_v50 = vld [vmem:[%s6858_s5 + $0x174] ss:$8 sps:$4 sm:$0xff]   ;;  %v4988_v33 = vld [vmem:[%s6858_s5 + $0x190] ss:$8 sps:$4 sm:$0xff]  }
 0x2e7   : > { %5115 = vrcp.f32 %v3229_v8  ;;  %v3236_v13 = vmul.f32 %v6567_v22, %v3220_v39  ;;  %v3222_v54 = vsel %vm3214_vm4, %v3166_v29, %v3198_v2  ;;  %v3234_v21 = vmul.f32 %v6557_v15, %v3218_v56  ;;  %v4990_v18 = vld [vmem:[%s6858_s5 + $0x194] ss:$8 sps:$4 sm:$0xff]   ;;  %v4993_v60 = vld [vmem:[%s6858_s5 + $0x1a4] ss:$8 sps:$4 sm:$0xff]   ;;  %v4997_v5 = vld [vmem:[%s6858_s5 + $0x1c0] ss:$8 sps:$4 sm:$0xff]  }
 0x2e8   : > { %5117 = vrcp.f32 %v3227_v6  ;;  %v3231_v44 = vsel %vm3215_vm7, %v3183_v7, %v3207_v14  ;;  %v3248_v35 = vmul.f32 %v5106_v63, %v3232_v49  ;;  %v3217_v31 = vsel %vm3209_vm3, %v6596_v47, %v6599_v17  ;;  %v4991_v63 = vld [vmem:[%s6858_s5 + $0x1a0] ss:$8 sps:$4 sm:$0xff]   ;;  %v4996_v6 = vld [vmem:[%s6858_s5 + $0x1b4] ss:$8 sps:$4 sm:$0xff]   ;;  %v4994_v7 = vld [vmem:[%s6858_s5 + $0x1b0] ss:$8 sps:$4 sm:$0xff]  }
 0x2e9   : > { %5119 = vrcp.f32 %v3231_v44  ;;  %v3238_v26 = vmul.f32 %v6569_v1, %v3222_v54  ;;  %v3221_v22 = vsel %vm3213_vm6, %v3165_v46, %v3197_v52  ;;  %v3233_v29 = vmul.f32 %v6559_v61, %v3217_v31  ;;  %v4976_v46 = vld [vmem:[%s6858_s5 + $0x150] ss:$8 sps:$4 sm:$0xff]   ;;  %v5002_v8 = vld [vmem:[%s6858_s5 + $0x1d4] ss:$8 sps:$4 sm:$0xff]   ;;  %v5005_v14 = vld [vmem:[%s6858_s5 + $0x1e4] ss:$8 sps:$4 sm:$0xff]  }
 0x2ea   : > { %v3219_v15 = vsel %vm3211_vm5, %v6601_v55, %v6604_v24  ;;  %v3237_v47 = vmul.f32 %v6571_v28, %v3221_v22  ;;  %v3223_v1 = vsel %vm3215_vm7, %v3167_v57, %v3199_v3  ;;  %v4961_v28 = vld [vmem:[%s6858_s5 + $0x100] ss:$8 sps:$4 sm:$0xff]   ;;  %v4982_v52 = vld [vmem:[%s6858_s5 + $0x170] ss:$8 sps:$4 sm:$0xff]   ;;  %v4999_v3 = vld [vmem:[%s6858_s5 + $0x1c4] ss:$8 sps:$4 sm:$0xff]  }
 0x2eb   : > { %v5108_v19 = vpop.eup %5107  ;;  %v3235_v11 = vmul.f32 %v6561_v59, %v3219_v15  ;;  %v3239_v61 = vmul.f32 %v6574_v0, %v3223_v1  ;;  %v4964_v59 = vld [vmem:[%s6858_s5 + $0x110] ss:$8 sps:$4 sm:$0xff]   ;;  %v4969_v0 = vld [vmem:[%s6858_s5 + $0x124] ss:$8 sps:$4 sm:$0xff]   ;;  %v4985_v57 = vld [vmem:[%s6858_s5 + $0x180] ss:$8 sps:$4 sm:$0xff]  }
 0x2ec   : > { %v5110_v9 = vpop.eup %5109  ;;  %v3252_v38 = vmul.f32 %v5108_v19, %v3236_v13  ;;  %v5000_v39 = vld [vmem:[%s6858_s5 + $0x1d0] ss:$8 sps:$4 sm:$0xff]   ;;  %v5003_v49 = vld [vmem:[%s6858_s5 + $0x1e0] ss:$8 sps:$4 sm:$0xff]   ;;  %v5008_v44 = vld [vmem:[%s6858_s5 + $0x1f4] ss:$8 sps:$4 sm:$0xff]  }
 0x2ed   : > { %v6649_v4 = vmul.f32 %v5110_v9, %v3234_v21  ;;  %v5006_v56 = vld [vmem:[%s6858_s5 + $0x1f0] ss:$8 sps:$4 sm:$0xff]   ;;  %v5009_v13 = vld [vmem:[%s6860_s7 + $0x40] sm:$0xff]   ;;  %v5011_v19 = vld [vmem:[%s6860_s7 + $0x48] sm:$0xff]  }
 0x2ee   : > { %v5112_v41 = vpop.eup %5111  ;;  %v3256_v42 = vpack.c.bf16 %v3252_v38, %v3248_v35  ;;  %v5010_v54 = vld [vmem:[%s6860_s7] sm:$0xff]   ;;  %4458 = vmatprep.subr.bf16.mxu1 %v5009_v13  ;;  %v5012_v9 = vld [vmem:[%s6860_s7 + $0x8] sm:$0xff]   ;;  %v5013_v35 = vld [vmem:[%s6860_s7 + $0x50] sm:$0xff]  }
 0x2ef   : > { %v5114_v16 = vpop.eup %5113  ;;  %v6651_v62 = vmul.f32 %v5112_v41, %v3238_v26  ;;  %4459 = vmatpush3.bf16.msra.mxu1 %v5010_v54  ;;  %v5014_v38 = vld [vmem:[%s6860_s7 + $0x10] sm:$0xff]   ;;  %v5015_v21 = vld [vmem:[%s6860_s7 + $0x58] sm:$0xff]   ;;  %v5017_v26 = vld [vmem:[%s6860_s7 + $0x60] sm:$0xff]  }
 0x2f0   : > { %v3249_v27 = vmul.f32 %v5114_v16, %v3233_v29  ;;  %4460 = vmatprep.subr.bf16.mxu1 %v5011_v19  ;;  %v5016_v31 = vld [vmem:[%s6860_s7 + $0x18] sm:$0xff]   ;;  %v5018_v22 = vld [vmem:[%s6860_s7 + $0x20] sm:$0xff]   ;;  %v5019_v41 = vld [vmem:[%s6860_s7 + $0x68] sm:$0xff]  }
 0x2f1   : > { %v5116_v17 = vpop.eup %5115  ;;  %v3258_v37 = vpack.c.bf16 %v6651_v62, %v6649_v4  ;;  %v5021_v16 = vld [vmem:[%s6860_s7 + $0x70] sm:$0xff]   ;;  %v5023_v62 = vld [vmem:[%s6860_s7 + $0x78] sm:$0xff]   ;;  %v3324_v15 = vld [vmem:[%s6859_s6] sm:$0x3] }
 0x2f2   : > { %v5118_v25 = vpop.eup %5117  ;;  %v3253_v51 = vmul.f32 %v5116_v17, %v3237_v47  ;;  %v5022_v4 = vld [vmem:[%s6860_s7 + $0x30] sm:$0xff]   ;;  %v5024_v29 = vld [vmem:[%s6860_s7 + $0x38] sm:$0xff]   ;;  %v3329_v47 = vrot.slane %v3324_v15, %v5623_v10  ;;  %v3333_v1 = vrot.slane %v3324_v15, %v5631_v12 }
 0x2f3   : > { %v5120_v20 = vpop.eup %5119  ;;  %v3251_v55 = vmul.f32 %v5118_v25, %v3235_v11  ;;  %4461 = vmatpush3.bf16.msra.mxu1 %v5012_v9 }
 0x2f4   : > { %v3257_v30 = vpack.c.bf16 %v3253_v51, %v3249_v27  ;;  %v3255_v24 = vmul.f32 %v5120_v20, %v3239_v61  ;;  %4462 = vmatprep.subr.bf16.mxu1 %v5013_v35 }
 0x2f6   : > { %3688 = vmatprep.mubr.bf16.mxu0 %v3257_v30  ;;  %v3259_v2 = vpack.c.bf16 %v3255_v24, %v3251_v55 }
 0x2f7   : > { %3689 = vmatmul.mubr.bf16.vlgmr.msra.gmra.mrb[8].mxu0 %v3256_v42  ;;  %4463 = vmatpush3.bf16.msra.mxu1 %v5014_v38  ;;  %v5020_v42 = vld [vmem:[%s6860_s7 + $0x28] sm:$0xff]  }
 0x2f8   : > { %3700 = vmatpush1.bf16.msra.mxu0 %v4961_v28  ;;  %3731 = vmatprep.mubr.bf16.mxu0 %v3259_v2 }
 0x2f9   : > { %3701 = vmatprep.subr.bf16.mxu0 %v4966_v58  ;;  %4464 = vmatprep.subr.bf16.mxu1 %v5015_v21 }
 0x2fb   : > { %4465 = vmatpush3.bf16.msra.mxu1 %v5016_v31 }
 0x2fc   : > { %3702 = vmatpush1.bf16.msra.mxu0 %v4964_v59  ;;  %4466 = vmatprep.subr.bf16.mxu1 %v5017_v26 }
 0x2fd   : > { %3703 = vmatprep.subr.bf16.mxu0 %v4969_v0 }
 0x2ff   : > { %4467 = vmatpush3.bf16.msra.mxu1 %v5018_v22 }
 0x300   : > { %3704 = vmatpush1.bf16.msra.mxu0 %v4967_v32  ;;  %4468 = vmatprep.subr.bf16.mxu1 %v5019_v41 }
 0x301   : > { %3705 = vmatprep.subr.bf16.mxu0 %v4972_v23 }
 0x303   : > { %4469 = vmatpush3.bf16.msra.mxu1 %v5020_v42 }
 0x304   : > { %3706 = vmatpush1.bf16.msra.mxu0 %v4970_v34  ;;  %4470 = vmatprep.subr.bf16.mxu1 %v5021_v16 }
 0x305   : > { %3707 = vmatprep.subr.bf16.mxu0 %v4975_v40 }
 0x307   : > { %4471 = vmatpush3.bf16.msra.mxu1 %v5022_v4 }
 0x308   : > { %3708 = vmatpush1.bf16.msra.mxu0 %v4973_v43  ;;  %4472 = vmatprep.subr.bf16.mxu1 %v5023_v62 }
 0x309   : > { %3709 = vmatprep.subr.bf16.mxu0 %v4978_v45 }
 0x30b   : > { %4473 = vmatpush3.bf16.msra.mxu1 %v5024_v29 }
 0x30c   : > { %3710 = vmatpush1.bf16.msra.mxu0 %v4976_v46 }
 0x30d   : > { %3711 = vmatprep.subr.bf16.mxu0 %v4981_v36 }
 0x310   : > { %3712 = vmatpush1.bf16.msra.mxu0 %v4979_v48 }
 0x311   : > { %3713 = vmatprep.subr.bf16.mxu0 %v4984_v50 }
 0x314   : > { %3714 = vmatpush1.bf16.msra.mxu0 %v4982_v52 }
 0x315   : > { %3715 = vmatprep.subr.bf16.mxu0 %v4987_v53 }
 0x318   : > { %3716 = vmatpush1.bf16.msra.mxu0 %v4985_v57 }
 0x319   : > { %3717 = vmatprep.subr.bf16.mxu0 %v4990_v18 }
 0x31c   : > { %3718 = vmatpush1.bf16.msra.mxu0 %v4988_v33 }
 0x31d   : > { %3719 = vmatprep.subr.bf16.mxu0 %v4993_v60 }
 0x320   : > { %3720 = vmatpush1.bf16.msra.mxu0 %v4991_v63 }
 0x321   : > { %3721 = vmatprep.subr.bf16.mxu0 %v4996_v6 }
 0x324   : > { %3722 = vmatpush1.bf16.msra.mxu0 %v4994_v7 }
 0x325   : > { %3723 = vmatprep.subr.bf16.mxu0 %v4999_v3 }
 0x328   : > { %3724 = vmatpush1.bf16.msra.mxu0 %v4997_v5 }
 0x329   : > { %3725 = vmatprep.subr.bf16.mxu0 %v5002_v8 }
 0x32c   : > { %3726 = vmatpush1.bf16.msra.mxu0 %v5000_v39 }
 0x32d   : > { %3727 = vmatprep.subr.bf16.mxu0 %v5005_v14 }
 0x330   : > { %3728 = vmatpush1.bf16.msra.mxu0 %v5003_v49 }
 0x331   : > { %3729 = vmatprep.subr.bf16.mxu0 %v5008_v44 }
 0x334   : > { %3730 = vmatpush1.bf16.msra.mxu0 %v5006_v56 }
 0x337   : > { %3732 = vmatmul.mubr.bf16.vlgmr.msra.gmra.mrb[8].mxu0 %v3258_v37 }
 0x40a   : > { %v3733_v17 = vpop.f32.mrb[8].mxu0 }
 0x40b   : > { %v6814_v37 = vadd.f32 %v3733_v17, %v3329_v47  ;;  %v3735_v25 = vpop.f32.mrb[9].mxu0 }
 0x40c   : > { %v6816_v27 = vadd.f32 %v3735_v25, %v3333_v1  ;;  %v3737_v51 = vpop.f32.mrb[10].mxu0 }
 0x40d   : > { %v3742_v11 = vand.u32 2147483647, %v6814_v37  ;;  %v6819_v61 = vadd.f32 %v3737_v51, %v3329_v47  ;;  %v3739_v20 = vpop.f32.mrb[11].mxu0  ;;  %vm3786_vm8 = vcmp.ge.f32.partialorder %v6814_v37, 0.0 }
 0x40e   : > { %v3743_v30 = vand.u32 2147483647, %v6816_v27  ;;  %v6822_v28 = vadd.f32 %v3739_v20, %v3333_v1  ;;  %vm3787_vm9 = vcmp.ge.f32.partialorder %v6816_v27, 0.0 }
 0x40f   : > { %v3746_v55 = vsub.f32 0.0, %v3742_v11  ;;  %v3744_v10 = vand.u32 2147483647, %v6819_v61  ;;  %vm3788_vm10 = vcmp.ge.f32.partialorder %v6819_v61, 0.0 }
 0x410   : > { %v3747_v12 = vsub.f32 0.0, %v3743_v30  ;;  %v3745_v24 = vand.u32 2147483647, %v6822_v28  ;;  %vm3789_vm11 = vcmp.ge.f32.partialorder %v6822_v28, 0.0 }
 0x411   : > { %v3750_v58 = vmul.f32 1.442695, %v3746_v55  ;;  %v3748_v2 = vsub.f32 0.0, %v3744_v10 }
 0x412   : > { %v3752_v59 = vmul.f32 1.442695, %v3747_v12  ;;  %v3749_v0 = vsub.f32 0.0, %v3745_v24 }
 0x413   : > { %5121 = vpow2.f32 %v3750_v58  ;;  %v3754_v32 = vmul.f32 1.442695, %v3748_v2 }
 0x414   : > { %5123 = vpow2.f32 %v3752_v59  ;;  %v3756_v23 = vmul.f32 1.442695, %v3749_v0 }
 0x415   : > { %5125 = vpow2.f32 %v3754_v32 }
 0x416   : > { %5127 = vpow2.f32 %v3756_v23 }
 0x41d   : > { %v5122_v34 = vpop.eup %5121 }
 0x41e   : > { %v5124_v40 = vpop.eup %5123  ;;  %v3758_v43 = vmul.f32 2.0, %v5122_v34  ;;  %v3774_v45 = vadd.f32 2.0, %v5122_v34 }
 0x41f   : > { %v5126_v46 = vpop.eup %5125  ;;  %v3759_v36 = vmul.f32 2.0, %v5124_v40  ;;  %v3775_v48 = vadd.f32 2.0, %v5124_v40 }
 0x420   : > { %v3762_v50 = vadd.f32 1.0, %v3758_v43  ;;  %v3766_v52 = vmul.f32 %v5122_v34, %v3758_v43  ;;  %v3778_v53 = vmul.f32 %v5122_v34, %v3774_v45  ;;  %v3760_v57 = vmul.f32 2.0, %v5126_v46  ;;  %v5128_v6 = vpop.eup %5127 }
 0x421   : > { %v3763_v18 = vadd.f32 1.0, %v3759_v36  ;;  %v3767_v33 = vmul.f32 %v5124_v40, %v3759_v36  ;;  %v3779_v60 = vmul.f32 %v5124_v40, %v3775_v48  ;;  %v3776_v63 = vadd.f32 2.0, %v5126_v46 }
 0x422   : > { %v3770_v7 = vadd.f32 %v3766_v52, %v3762_v50  ;;  %v3782_v3 = vadd.f32 2.0, %v3778_v53  ;;  %v3764_v5 = vadd.f32 1.0, %v3760_v57  ;;  %v3768_v49 = vmul.f32 %v5126_v46, %v3760_v57 }
 0x423   : > { %v3771_v8 = vadd.f32 %v3767_v33, %v3763_v18  ;;  %v3783_v39 = vadd.f32 2.0, %v3779_v60  ;;  %v3780_v44 = vmul.f32 %v5126_v46, %v3776_v63  ;;  %v3761_v56 = vmul.f32 2.0, %v5128_v6 }
 0x424   : > { %v3794_v14 = vsel %vm3786_vm8, %v3770_v7, %v3782_v3  ;;  %v3777_v13 = vadd.f32 2.0, %v5128_v6  ;;  %v3772_v54 = vadd.f32 %v3768_v49, %v3764_v5  ;;  %v3790_v42 = vsel %vm3786_vm8, %v3762_v50, %v3778_v53 }
 0x425   : > { %5129 = vrcp.f32 %v3794_v14  ;;  %v3784_v19 = vadd.f32 2.0, %v3780_v44  ;;  %v3795_v9 = vsel %vm3787_vm9, %v3771_v8, %v3783_v39  ;;  %v3765_v35 = vadd.f32 1.0, %v3761_v56 }
 0x426   : > { %v3769_v38 = vmul.f32 %v5128_v6, %v3761_v56  ;;  %v3781_v21 = vmul.f32 %v5128_v6, %v3777_v13  ;;  %v3792_v16 = vsel %vm3788_vm10, %v3764_v5, %v3780_v44  ;;  %v3798_v62 = vmul.f32 %v6814_v37, %v3790_v42 }
 0x427   : > { %v3796_v31 = vsel %vm3788_vm10, %v3772_v54, %v3784_v19  ;;  %v3791_v29 = vsel %vm3787_vm9, %v3763_v18, %v3779_v60  ;;  %v3800_v15 = vmul.f32 %v6819_v61, %v3792_v16  ;;  %v4439_v61 = vld [vmem:[%s6861_s8] ss:$0 sm:$0xff] }
 0x428   : > { %5131 = vrcp.f32 %v3796_v31  ;;  %v3773_v26 = vadd.f32 %v3769_v38, %v3765_v35  ;;  %v3785_v22 = vadd.f32 2.0, %v3781_v21  ;;  %v3793_v47 = vsel %vm3789_vm11, %v3765_v35, %v3781_v21 }
 0x429   : > { %5133 = vrcp.f32 %v3795_v9  ;;  %v3799_v11 = vmul.f32 %v6816_v27, %v3791_v29  ;;  %v3801_v20 = vmul.f32 %v6822_v28, %v3793_v47 }
 0x42a   : > { %v3797_v41 = vsel %vm3789_vm11, %v3773_v26, %v3785_v22 }
 0x42b   : > { %5135 = vrcp.f32 %v3797_v41 }
 0x42f   : > { %v5130_v4 = vpop.eup %5129 }
 0x430   : > { %v3806_v25 = vmul.f32 %v5130_v4, %v3798_v62 }
 0x432   : > { %v5132_v1 = vpop.eup %5131 }
 0x433   : > { %v5134_v17 = vpop.eup %5133  ;;  %v3808_v51 = vmul.f32 %v5132_v1, %v3800_v15 }
 0x434   : > { %v3807_v10 = vmul.f32 %v5134_v17, %v3799_v11 }
 0x435   : > { %v5136_v30 = vpop.eup %5135  ;;  %v3810_v55 = vpack.c.bf16 %v3808_v51, %v3806_v25 }
 0x436   : > { %v3809_v12 = vmul.f32 %v5136_v30, %v3801_v20 }
 0x438   : > { %v3811_v37 = vpack.c.bf16 %v3809_v12, %v3807_v10 }
 0x43a   : > { %3979 = vmatprep.mubr.bf16.mxu1 %v3811_v37 }
 0x43b   : > { %3980 = vmatmul.mubr.bf16.vlgmr.msra.gmra.mrb[16].mxu1 %v3810_v55 }
 0x50e   : > { %v4474_v24 = vpop.f32.mrb[16].mxu1 }
 0x50f   : > { %v4475_v58 = vpop.f32.mrb[17].mxu1 }
 0x510   : > { %v4476_v2 = vadd.f32 %v4475_v58, %v4474_v24  ;;  %v4477_v59 = vpop.f32.mrb[18].mxu1 }
 0x511   : > { %v4478_v27 = vpop.f32.mrb[19].mxu1 }
 0x512   : > { %v3982_v28 = vadd.f32 %v4476_v2, %v4439_v61  ;;  %v4479_v0 = vadd.f32 %v4478_v27, %v4477_v59 }
 0x514   : > { %3988 = vst [vmem:[%s334_s13] sm:$0xff] %v3982_v28  ;;  %v3985_v32 = vadd.f32 %v4479_v0, %v4439_v61 }
 0x516   : > { %3989 = vst [vmem:[%s334_s13 + $0x8] sm:$0xff] %v3985_v32 }
 0x517 PF: > { %s19_s30 = sadd.s32 1, %s5143_s30  }
 0x518   : > { %p16_p4 = scmp.ge.s32.totalorder %s19_s30, 4  }
 0x51a   :  { %18 = sbr.rel (!%p16_p4) target bundleno = 1 (0x1), region = 86 }

</bundles_post_ra>
